<compile_context>
chip_gen: v7x
topology: tpu7x:2x2x1
jax: 0.10.0
libtpu: 0.0.40
codegen_flags: <defaults>
</compile_context>

<pallas_src>
import jax
import jax.numpy as jnp
from jax.experimental import pallas as pl
from jax.experimental.pallas import tpu as pltpu

# ---------------------------------------------------------------------------
# Small config consistent with the module (args.vocab_size / embed_dim / pad_idx)
# ---------------------------------------------------------------------------
BATCH = 2
SEQ = 16                     # must be >= max(TOKEN_GROUPS); multiple of 8
EMBED_DIM = 32
VOCAB = 100
PAD_IDX = 0
CO = 100                     # Conv output channels (spec: Co = 100)
CO_PAD = 128                 # lane-aligned Co
VOCAB_PAD = 128              # lane/K-aligned vocab for the one-hot matmul
TOKEN_GROUPS = (3, 4, 5, 6, 7)


# ---------------------------------------------------------------------------
# Fused kernel: embedding + all conv branches + max-pool + bias/ReLU + FC + tanh
# ---------------------------------------------------------------------------
def make_textcnn_kernel(batch, seq, groups, co_pad):
    def kernel(ids_ref, emb_ref, wconv_ref, bconv_ref, fcw_ref, fcb_ref, out_ref):
        B, S = batch, seq
        BS = B * S
        Vp = emb_ref.shape[0]

        # --- embedding lookup as one-hot @ table (MXU). The padding_idx row of
        #     the table is zero, so nn.Embedding(padding_idx=...) is exact.
        ids = ids_ref[...]                                             # (BS, 1)
        onehot = (jax.lax.broadcasted_iota(jnp.int32, (BS, Vp), 1) == ids
                  ).astype(jnp.float32)                                # (BS, Vp)
        x = jnp.dot(onehot, emb_ref[...],
                    preferred_element_type=jnp.float32)                # (BS, E)

        # --- every tap of every conv branch in ONE wide MXU matmul
        y = jnp.dot(x, wconv_ref[...],
                    preferred_element_type=jnp.float32)      # (BS, sum_g g*128)

        # token position of each flattened row (used to mask invalid windows)
        row = jax.lax.broadcasted_iota(jnp.int32, (BS, 1), 0)
        t_idx = (row & (S - 1)) if (S & (S - 1)) == 0 else (row % S)

        pooled = []
        col = 0
        NEG = jnp.float32(-1e30)
        for g in groups:
            T = S - g + 1                        # valid conv positions
            acc = y[:, col:col + co_pad]         # tap j = 0 (no shift)
            col += co_pad
            for j in range(1, g):
                yj = y[:, col:col + co_pad]      # lane-tile aligned slice (free)
                col += co_pad
                # acc[r] += yj[r + j]; sublane roll (jnp.roll semantics),
                # wrapped / cross-batch rows are masked below.
                acc = acc + pltpu.roll(yj, BS - j, 0)
            acc = jnp.where(t_idx < T, acc, NEG)               # kill t >= T rows
            pooled.append(jnp.max(acc.reshape(B, S, co_pad), axis=1))   # (B, Co)

        # bias + ReLU commute with max-over-time -> apply after pooling; concat
        # of 128-wide blocks is free lane-block placement.
        feats = jnp.maximum(jnp.concatenate(pooled, axis=1) + bconv_ref[...], 0.0)
        out_ref[...] = jnp.tanh(
            jnp.dot(feats, fcw_ref[...], preferred_element_type=jnp.float32)
            + fcb_ref[...])

    return kernel


# ---------------------------------------------------------------------------
# Weight packing (done once in the wrapper, outside the kernel)
# ---------------------------------------------------------------------------
def pack_params(params):
    """Pad Co->128 / V->128 and pre-concatenate weights into fused layouts."""
    E = EMBED_DIM
    emb = jnp.zeros((VOCAB_PAD, E), jnp.float32).at[:VOCAB].set(params['emb'])
    wblocks, bblocks, fwblocks = [], [], []
    for gi, g in enumerate(TOKEN_GROUPS):
        w = params[f'conv_w{g}']                                     # (g, E, Co)
        for j in range(g):
            wblocks.append(
                jnp.zeros((E, CO_PAD), jnp.float32).at[:, :CO].set(w[j]))
        bblocks.append(
            jnp.zeros((1, CO_PAD), jnp.float32).at[:, :CO].set(params[f'conv_b{g}']))
        fwblocks.append(
            jnp.zeros((CO_PAD, E), jnp.float32).at[:CO].set(params['fc_w'][gi]))
    return {
        'emb': emb,                                    # (128, E)
        'conv_w': jnp.concatenate(wblocks, axis=1),    # (E, sum_g g*128) = (E, 3200)
        'conv_b': jnp.concatenate(bblocks, axis=1),    # (1, 5*128)
        'fc_w': jnp.concatenate(fwblocks, axis=0),     # (5*128, E)
        'fc_b': params['fc_b'],                        # (1, E)
    }


# ---------------------------------------------------------------------------
# pallas_call wrapper: single grid-less call, full arrays resident in VMEM
# ---------------------------------------------------------------------------
def textcnn_forward(packed, input_ids, attention_mask=None):
    # attention_mask accepted for API parity; the reference forward ignores it.
    del attention_mask
    B, S = input_ids.shape
    assert S >= max(TOKEN_GROUPS) and S % 8 == 0
    ids_col = input_ids.reshape(B * S, 1).astype(jnp.int32)

    args = (ids_col, packed['emb'], packed['conv_w'], packed['conv_b'],
            packed['fc_w'], packed['fc_b'])
    vmem = pl.BlockSpec(memory_space=pltpu.MemorySpace.VMEM)
    return pl.pallas_call(
        make_textcnn_kernel(B, S, TOKEN_GROUPS, CO_PAD),
        out_shape=jax.ShapeDtypeStruct((B, EMBED_DIM), jnp.float32),
        in_specs=[vmem] * len(args),
        out_specs=vmem,
    )(*args)


# ---------------------------------------------------------------------------
# Deterministic parameter init (raw, un-padded layouts; used by the reference).
# Conv weight stored as (g, E, Co); FC weight split per branch as (G, Co, E).
# ---------------------------------------------------------------------------
def init_params(key):
    ks = jax.random.split(key, 13)
    emb = 0.5 * jax.random.normal(ks[0], (VOCAB, EMBED_DIM), jnp.float32)
    emb = emb.at[PAD_IDX].set(0.0)                 # nn.Embedding padding_idx row
    params = {'emb': emb}
    for i, g in enumerate(TOKEN_GROUPS):
        params[f'conv_w{g}'] = 0.1 * jax.random.normal(
            ks[1 + 2 * i], (g, EMBED_DIM, CO), jnp.float32)
        params[f'conv_b{g}'] = 0.1 * jax.random.normal(
            ks[2 + 2 * i], (1, CO), jnp.float32)
    params['fc_w'] = 0.05 * jax.random.normal(
        ks[11], (len(TOKEN_GROUPS), CO, EMBED_DIM), jnp.float32)
    params['fc_b'] = 0.05 * jax.random.normal(
        ks[12], (1, EMBED_DIM), jnp.float32)
    return params


# ---------------------------------------------------------------------------
# Pure-JAX reference mirroring the PyTorch forward (windowed Conv2d, ReLU,
# max-pool-over-time, cat + single Linear + Tanh) for a correctness check.
# ---------------------------------------------------------------------------
def ref_forward(params, input_ids, attention_mask=None):
    del attention_mask
    B, S = input_ids.shape
    x = jnp.take(params['emb'], input_ids, axis=0)                  # (B, S, E)
    branch_feats = []
    for g in TOKEN_GROUPS:
        w = params[f'conv_w{g}'].reshape(g * EMBED_DIM, CO)
        T = S - g + 1
        cols = []
        for t in range(T):
            win = x[:, t:t + g, :].reshape(B, g * EMBED_DIM)
            cols.append(win @ w)                                    # (B, Co)
        conv = jnp.stack(cols, axis=1) + params[f'conv_b{g}']       # (B, T, Co)
        conv = jax.nn.relu(conv)
        branch_feats.append(conv.max(axis=1))                       # (B, Co)
    cat = jnp.concatenate(branch_feats, axis=1)                     # (B, G*Co)
    fcw_full = params['fc_w'].reshape(len(TOKEN_GROUPS) * CO, EMBED_DIM)
    return jnp.tanh(cat @ fcw_full + params['fc_b'])


if __name__ == "__main__":
    key = jax.random.PRNGKey(0)
    pkey, ikey = jax.random.split(key)
    params = init_params(pkey)
    packed = pack_params(params)

    input_ids = jax.random.randint(ikey, (BATCH, SEQ), 1, VOCAB, dtype=jnp.int32)
    # pad out the tail of the second sequence (padding rows embed to zero)
    input_ids = input_ids.at[1, SEQ - 3:].set(PAD_IDX)
    attention_mask = (input_ids != PAD_IDX).astype(jnp.int32)  # unused by forward

    feat = textcnn_forward(packed, input_ids, attention_mask)
    feat = jax.block_until_ready(feat)

    assert feat.shape == (BATCH, EMBED_DIM) and feat.dtype == jnp.float32
    assert bool(jnp.all(jnp.isfinite(feat)))

    ref = ref_forward(params, input_ids, attention_mask)
    max_err = float(jnp.max(jnp.abs(feat - ref)))
    assert bool(jnp.allclose(feat, ref, rtol=1e-4, atol=1e-4)), f"max|diff|={max_err}"

    print("KERNEL_OK")
</pallas_src>

<mosaic_0001>
module attributes {stable_mosaic.version = 11 : i64} {
  func.func @kernel(%arg0: memref<32x1xi32, #tpu.memory_space<vmem>>, %arg1: memref<128x32xf32, #tpu.memory_space<vmem>>, %arg2: memref<32x3200xf32, #tpu.memory_space<vmem>>, %arg3: memref<1x640xf32, #tpu.memory_space<vmem>>, %arg4: memref<640x32xf32, #tpu.memory_space<vmem>>, %arg5: memref<1x32xf32, #tpu.memory_space<vmem>>, %arg6: memref<2x32xf32, #tpu.memory_space<vmem>>) attributes {dimension_semantics = [], scalar_prefetch = 0 : i64, scratch_operands = 0 : i64, tpu.core_type = #tpu.core_type<tc>} {
    %c0 = arith.constant 0 : index
    %c0_0 = arith.constant 0 : index
    %0 = vector.load %arg0[%c0, %c0_0] : memref<32x1xi32, #tpu.memory_space<vmem>>, vector<32x1xi32>
    %1 = tpu.iota {dimensions = array<i32: 1>} : vector<32x128xi32>
    %2 = vector.broadcast %0 : vector<32x1xi32> to vector<32x128xi32>
    %3 = arith.cmpi eq, %1, %2 : vector<32x128xi32>
    %4 = arith.extui %3 : vector<32x128xi1> to vector<32x128xi32>
    %5 = arith.sitofp %4 : vector<32x128xi32> to vector<32x128xf32>
    %c0_1 = arith.constant 0 : index
    %c0_2 = arith.constant 0 : index
    %6 = vector.load %arg1[%c0_1, %c0_2] : memref<128x32xf32, #tpu.memory_space<vmem>>, vector<128x32xf32>
    %cst = arith.constant dense<0.000000e+00> : vector<32x32xf32>
    %7 = tpu.matmul %5, %6, %cst {dimension_numbers = #tpu.dot_dimension_numbers<[1], [0], [0], [1], [0, 0, 1, 1], [], []>} : vector<32x128xf32>, vector<128x32xf32>, vector<32x32xf32> -> vector<32x32xf32>
    %c0_3 = arith.constant 0 : index
    %c0_4 = arith.constant 0 : index
    %8 = vector.load %arg2[%c0_3, %c0_4] : memref<32x3200xf32, #tpu.memory_space<vmem>>, vector<32x3200xf32>
    %cst_5 = arith.constant dense<0.000000e+00> : vector<32x3200xf32>
    %9 = tpu.matmul %7, %8, %cst_5 {dimension_numbers = #tpu.dot_dimension_numbers<[1], [0], [0], [1], [0, 0, 1, 1], [], []>} : vector<32x32xf32>, vector<32x3200xf32>, vector<32x3200xf32> -> vector<32x3200xf32>
    %10 = tpu.iota {dimensions = array<i32: 0>} : vector<32x1xi32>
    %c15_i32 = arith.constant 15 : i32
    %11 = vector.broadcast %c15_i32 : i32 to vector<32x1xi32>
    %12 = arith.andi %10, %11 : vector<32x1xi32>
    %13 = vector.extract_strided_slice %9 {offsets = [0, 0], sizes = [32, 128], strides = [1, 1]} : vector<32x3200xf32> to vector<32x128xf32>
    %14 = vector.extract_strided_slice %9 {offsets = [0, 128], sizes = [32, 128], strides = [1, 1]} : vector<32x3200xf32> to vector<32x128xf32>
    %c31_i32 = arith.constant 31 : i32
    %15 = tpu.dynamic_rotate %14 by %c31_i32 dim 0 : vector<32x128xf32>, i32 -> vector<32x128xf32>
    %16 = arith.addf %13, %15 : vector<32x128xf32>
    %17 = vector.extract_strided_slice %9 {offsets = [0, 256], sizes = [32, 128], strides = [1, 1]} : vector<32x3200xf32> to vector<32x128xf32>
    %c30_i32 = arith.constant 30 : i32
    %18 = tpu.dynamic_rotate %17 by %c30_i32 dim 0 : vector<32x128xf32>, i32 -> vector<32x128xf32>
    %19 = arith.addf %16, %18 : vector<32x128xf32>
    %c14_i32 = arith.constant 14 : i32
    %20 = vector.broadcast %c14_i32 : i32 to vector<32x1xi32>
    %21 = arith.cmpi slt, %12, %20 : vector<32x1xi32>
    %cst_6 = arith.constant -1.000000e+30 : f32
    %22 = vector.shape_cast %21 : vector<32x1xi1> to vector<32x1xi1>
    %23 = vector.broadcast %22 : vector<32x1xi1> to vector<32x128xi1>
    %24 = vector.broadcast %cst_6 : f32 to vector<32x128xf32>
    %25 = arith.select %23, %19, %24 : vector<32x128xi1>, vector<32x128xf32>
    %26 = vector.shape_cast %25 : vector<32x128xf32> to vector<2x16x128xf32>
    %cst_7 = arith.constant dense<0xFF800000> : vector<2x128xf32>
    %27 = vector.multi_reduction <maximumf>, %26, %cst_7 [1] : vector<2x16x128xf32> to vector<2x128xf32>
    %28 = vector.extract_strided_slice %9 {offsets = [0, 384], sizes = [32, 128], strides = [1, 1]} : vector<32x3200xf32> to vector<32x128xf32>
    %29 = vector.extract_strided_slice %9 {offsets = [0, 512], sizes = [32, 128], strides = [1, 1]} : vector<32x3200xf32> to vector<32x128xf32>
    %c31_i32_8 = arith.constant 31 : i32
    %30 = tpu.dynamic_rotate %29 by %c31_i32_8 dim 0 : vector<32x128xf32>, i32 -> vector<32x128xf32>
    %31 = arith.addf %28, %30 : vector<32x128xf32>
    %32 = vector.extract_strided_slice %9 {offsets = [0, 640], sizes = [32, 128], strides = [1, 1]} : vector<32x3200xf32> to vector<32x128xf32>
    %c30_i32_9 = arith.constant 30 : i32
    %33 = tpu.dynamic_rotate %32 by %c30_i32_9 dim 0 : vector<32x128xf32>, i32 -> vector<32x128xf32>
    %34 = arith.addf %31, %33 : vector<32x128xf32>
    %35 = vector.extract_strided_slice %9 {offsets = [0, 768], sizes = [32, 128], strides = [1, 1]} : vector<32x3200xf32> to vector<32x128xf32>
    %c29_i32 = arith.constant 29 : i32
    %36 = tpu.dynamic_rotate %35 by %c29_i32 dim 0 : vector<32x128xf32>, i32 -> vector<32x128xf32>
    %37 = arith.addf %34, %36 : vector<32x128xf32>
    %c13_i32 = arith.constant 13 : i32
    %38 = vector.broadcast %c13_i32 : i32 to vector<32x1xi32>
    %39 = arith.cmpi slt, %12, %38 : vector<32x1xi32>
    %cst_10 = arith.constant -1.000000e+30 : f32
    %40 = vector.shape_cast %39 : vector<32x1xi1> to vector<32x1xi1>
    %41 = vector.broadcast %40 : vector<32x1xi1> to vector<32x128xi1>
    %42 = vector.broadcast %cst_10 : f32 to vector<32x128xf32>
    %43 = arith.select %41, %37, %42 : vector<32x128xi1>, vector<32x128xf32>
    %44 = vector.shape_cast %43 : vector<32x128xf32> to vector<2x16x128xf32>
    %cst_11 = arith.constant dense<0xFF800000> : vector<2x128xf32>
    %45 = vector.multi_reduction <maximumf>, %44, %cst_11 [1] : vector<2x16x128xf32> to vector<2x128xf32>
    %46 = vector.extract_strided_slice %9 {offsets = [0, 896], sizes = [32, 128], strides = [1, 1]} : vector<32x3200xf32> to vector<32x128xf32>
    %47 = vector.extract_strided_slice %9 {offsets = [0, 1024], sizes = [32, 128], strides = [1, 1]} : vector<32x3200xf32> to vector<32x128xf32>
    %c31_i32_12 = arith.constant 31 : i32
    %48 = tpu.dynamic_rotate %47 by %c31_i32_12 dim 0 : vector<32x128xf32>, i32 -> vector<32x128xf32>
    %49 = arith.addf %46, %48 : vector<32x128xf32>
    %50 = vector.extract_strided_slice %9 {offsets = [0, 1152], sizes = [32, 128], strides = [1, 1]} : vector<32x3200xf32> to vector<32x128xf32>
    %c30_i32_13 = arith.constant 30 : i32
    %51 = tpu.dynamic_rotate %50 by %c30_i32_13 dim 0 : vector<32x128xf32>, i32 -> vector<32x128xf32>
    %52 = arith.addf %49, %51 : vector<32x128xf32>
    %53 = vector.extract_strided_slice %9 {offsets = [0, 1280], sizes = [32, 128], strides = [1, 1]} : vector<32x3200xf32> to vector<32x128xf32>
    %c29_i32_14 = arith.constant 29 : i32
    %54 = tpu.dynamic_rotate %53 by %c29_i32_14 dim 0 : vector<32x128xf32>, i32 -> vector<32x128xf32>
    %55 = arith.addf %52, %54 : vector<32x128xf32>
    %56 = vector.extract_strided_slice %9 {offsets = [0, 1408], sizes = [32, 128], strides = [1, 1]} : vector<32x3200xf32> to vector<32x128xf32>
    %c28_i32 = arith.constant 28 : i32
    %57 = tpu.dynamic_rotate %56 by %c28_i32 dim 0 : vector<32x128xf32>, i32 -> vector<32x128xf32>
    %58 = arith.addf %55, %57 : vector<32x128xf32>
    %c12_i32 = arith.constant 12 : i32
    %59 = vector.broadcast %c12_i32 : i32 to vector<32x1xi32>
    %60 = arith.cmpi slt, %12, %59 : vector<32x1xi32>
    %cst_15 = arith.constant -1.000000e+30 : f32
    %61 = vector.shape_cast %60 : vector<32x1xi1> to vector<32x1xi1>
    %62 = vector.broadcast %61 : vector<32x1xi1> to vector<32x128xi1>
    %63 = vector.broadcast %cst_15 : f32 to vector<32x128xf32>
    %64 = arith.select %62, %58, %63 : vector<32x128xi1>, vector<32x128xf32>
    %65 = vector.shape_cast %64 : vector<32x128xf32> to vector<2x16x128xf32>
    %cst_16 = arith.constant dense<0xFF800000> : vector<2x128xf32>
    %66 = vector.multi_reduction <maximumf>, %65, %cst_16 [1] : vector<2x16x128xf32> to vector<2x128xf32>
    %67 = vector.extract_strided_slice %9 {offsets = [0, 1536], sizes = [32, 128], strides = [1, 1]} : vector<32x3200xf32> to vector<32x128xf32>
    %68 = vector.extract_strided_slice %9 {offsets = [0, 1664], sizes = [32, 128], strides = [1, 1]} : vector<32x3200xf32> to vector<32x128xf32>
    %c31_i32_17 = arith.constant 31 : i32
    %69 = tpu.dynamic_rotate %68 by %c31_i32_17 dim 0 : vector<32x128xf32>, i32 -> vector<32x128xf32>
    %70 = arith.addf %67, %69 : vector<32x128xf32>
    %71 = vector.extract_strided_slice %9 {offsets = [0, 1792], sizes = [32, 128], strides = [1, 1]} : vector<32x3200xf32> to vector<32x128xf32>
    %c30_i32_18 = arith.constant 30 : i32
    %72 = tpu.dynamic_rotate %71 by %c30_i32_18 dim 0 : vector<32x128xf32>, i32 -> vector<32x128xf32>
    %73 = arith.addf %70, %72 : vector<32x128xf32>
    %74 = vector.extract_strided_slice %9 {offsets = [0, 1920], sizes = [32, 128], strides = [1, 1]} : vector<32x3200xf32> to vector<32x128xf32>
    %c29_i32_19 = arith.constant 29 : i32
    %75 = tpu.dynamic_rotate %74 by %c29_i32_19 dim 0 : vector<32x128xf32>, i32 -> vector<32x128xf32>
    %76 = arith.addf %73, %75 : vector<32x128xf32>
    %77 = vector.extract_strided_slice %9 {offsets = [0, 2048], sizes = [32, 128], strides = [1, 1]} : vector<32x3200xf32> to vector<32x128xf32>
    %c28_i32_20 = arith.constant 28 : i32
    %78 = tpu.dynamic_rotate %77 by %c28_i32_20 dim 0 : vector<32x128xf32>, i32 -> vector<32x128xf32>
    %79 = arith.addf %76, %78 : vector<32x128xf32>
    %80 = vector.extract_strided_slice %9 {offsets = [0, 2176], sizes = [32, 128], strides = [1, 1]} : vector<32x3200xf32> to vector<32x128xf32>
    %c27_i32 = arith.constant 27 : i32
    %81 = tpu.dynamic_rotate %80 by %c27_i32 dim 0 : vector<32x128xf32>, i32 -> vector<32x128xf32>
    %82 = arith.addf %79, %81 : vector<32x128xf32>
    %c11_i32 = arith.constant 11 : i32
    %83 = vector.broadcast %c11_i32 : i32 to vector<32x1xi32>
    %84 = arith.cmpi slt, %12, %83 : vector<32x1xi32>
    %cst_21 = arith.constant -1.000000e+30 : f32
    %85 = vector.shape_cast %84 : vector<32x1xi1> to vector<32x1xi1>
    %86 = vector.broadcast %85 : vector<32x1xi1> to vector<32x128xi1>
    %87 = vector.broadcast %cst_21 : f32 to vector<32x128xf32>
    %88 = arith.select %86, %82, %87 : vector<32x128xi1>, vector<32x128xf32>
    %89 = vector.shape_cast %88 : vector<32x128xf32> to vector<2x16x128xf32>
    %cst_22 = arith.constant dense<0xFF800000> : vector<2x128xf32>
    %90 = vector.multi_reduction <maximumf>, %89, %cst_22 [1] : vector<2x16x128xf32> to vector<2x128xf32>
    %91 = vector.extract_strided_slice %9 {offsets = [0, 2304], sizes = [32, 128], strides = [1, 1]} : vector<32x3200xf32> to vector<32x128xf32>
    %92 = vector.extract_strided_slice %9 {offsets = [0, 2432], sizes = [32, 128], strides = [1, 1]} : vector<32x3200xf32> to vector<32x128xf32>
    %c31_i32_23 = arith.constant 31 : i32
    %93 = tpu.dynamic_rotate %92 by %c31_i32_23 dim 0 : vector<32x128xf32>, i32 -> vector<32x128xf32>
    %94 = arith.addf %91, %93 : vector<32x128xf32>
    %95 = vector.extract_strided_slice %9 {offsets = [0, 2560], sizes = [32, 128], strides = [1, 1]} : vector<32x3200xf32> to vector<32x128xf32>
    %c30_i32_24 = arith.constant 30 : i32
    %96 = tpu.dynamic_rotate %95 by %c30_i32_24 dim 0 : vector<32x128xf32>, i32 -> vector<32x128xf32>
    %97 = arith.addf %94, %96 : vector<32x128xf32>
    %98 = vector.extract_strided_slice %9 {offsets = [0, 2688], sizes = [32, 128], strides = [1, 1]} : vector<32x3200xf32> to vector<32x128xf32>
    %c29_i32_25 = arith.constant 29 : i32
    %99 = tpu.dynamic_rotate %98 by %c29_i32_25 dim 0 : vector<32x128xf32>, i32 -> vector<32x128xf32>
    %100 = arith.addf %97, %99 : vector<32x128xf32>
    %101 = vector.extract_strided_slice %9 {offsets = [0, 2816], sizes = [32, 128], strides = [1, 1]} : vector<32x3200xf32> to vector<32x128xf32>
    %c28_i32_26 = arith.constant 28 : i32
    %102 = tpu.dynamic_rotate %101 by %c28_i32_26 dim 0 : vector<32x128xf32>, i32 -> vector<32x128xf32>
    %103 = arith.addf %100, %102 : vector<32x128xf32>
    %104 = vector.extract_strided_slice %9 {offsets = [0, 2944], sizes = [32, 128], strides = [1, 1]} : vector<32x3200xf32> to vector<32x128xf32>
    %c27_i32_27 = arith.constant 27 : i32
    %105 = tpu.dynamic_rotate %104 by %c27_i32_27 dim 0 : vector<32x128xf32>, i32 -> vector<32x128xf32>
    %106 = arith.addf %103, %105 : vector<32x128xf32>
    %107 = vector.extract_strided_slice %9 {offsets = [0, 3072], sizes = [32, 128], strides = [1, 1]} : vector<32x3200xf32> to vector<32x128xf32>
    %c26_i32 = arith.constant 26 : i32
    %108 = tpu.dynamic_rotate %107 by %c26_i32 dim 0 : vector<32x128xf32>, i32 -> vector<32x128xf32>
    %109 = arith.addf %106, %108 : vector<32x128xf32>
    %c10_i32 = arith.constant 10 : i32
    %110 = vector.broadcast %c10_i32 : i32 to vector<32x1xi32>
    %111 = arith.cmpi slt, %12, %110 : vector<32x1xi32>
    %cst_28 = arith.constant -1.000000e+30 : f32
    %112 = vector.shape_cast %111 : vector<32x1xi1> to vector<32x1xi1>
    %113 = vector.broadcast %112 : vector<32x1xi1> to vector<32x128xi1>
    %114 = vector.broadcast %cst_28 : f32 to vector<32x128xf32>
    %115 = arith.select %113, %109, %114 : vector<32x128xi1>, vector<32x128xf32>
    %116 = vector.shape_cast %115 : vector<32x128xf32> to vector<2x16x128xf32>
    %cst_29 = arith.constant dense<0xFF800000> : vector<2x128xf32>
    %117 = vector.multi_reduction <maximumf>, %116, %cst_29 [1] : vector<2x16x128xf32> to vector<2x128xf32>
    %118 = tpu.concatenate %27, %45, %66, %90, %117 in 1 : vector<2x128xf32>, vector<2x128xf32>, vector<2x128xf32>, vector<2x128xf32>, vector<2x128xf32> -> vector<2x640xf32>
    %c0_30 = arith.constant 0 : index
    %c0_31 = arith.constant 0 : index
    %119 = vector.load %arg3[%c0_30, %c0_31] : memref<1x640xf32, #tpu.memory_space<vmem>>, vector<1x640xf32>
    %120 = vector.broadcast %119 : vector<1x640xf32> to vector<2x640xf32>
    %121 = arith.addf %118, %120 : vector<2x640xf32>
    %cst_32 = arith.constant 0.000000e+00 : f32
    %122 = vector.broadcast %cst_32 : f32 to vector<2x640xf32>
    %123 = arith.maximumf %121, %122 : vector<2x640xf32>
    %c0_33 = arith.constant 0 : index
    %c0_34 = arith.constant 0 : index
    %124 = vector.load %arg4[%c0_33, %c0_34] : memref<640x32xf32, #tpu.memory_space<vmem>>, vector<640x32xf32>
    %cst_35 = arith.constant dense<0.000000e+00> : vector<2x32xf32>
    %125 = tpu.matmul %123, %124, %cst_35 {dimension_numbers = #tpu.dot_dimension_numbers<[1], [0], [0], [1], [0, 0, 1, 1], [], []>} : vector<2x640xf32>, vector<640x32xf32>, vector<2x32xf32> -> vector<2x32xf32>
    %c0_36 = arith.constant 0 : index
    %c0_37 = arith.constant 0 : index
    %126 = vector.load %arg5[%c0_36, %c0_37] : memref<1x32xf32, #tpu.memory_space<vmem>>, vector<1x32xf32>
    %127 = vector.broadcast %126 : vector<1x32xf32> to vector<2x32xf32>
    %128 = arith.addf %125, %127 : vector<2x32xf32>
    %129 = math.tanh %128 : vector<2x32xf32>
    %c0_38 = arith.constant 0 : index
    %c0_39 = arith.constant 0 : index
    %130 = vector.load %arg6[%c0_38, %c0_39] : memref<2x32xf32, #tpu.memory_space<vmem>>, vector<2x32xf32>
    tpu.vector_store %arg6[%c0_38, %c0_39], %129 {strides = array<i32>} : memref<2x32xf32, #tpu.memory_space<vmem>>, vector<2x32xf32>,
    return
  }
}

</mosaic_0001>

<bundles_post_ra>
// kernel: tpu_custom_call.1
= control target key start
LH: loop header
LB: loop body
LE: loop exit
PB: predicated region body
PF: predicated region fallthrough
CT: control target
= control target key end

     0   :  { %v2723_v2 = vmov 0   ;;  %s3874_s0 = inlined_call_operand.vmem [shape: s32[32,1], index: 0, kind: input, shape index: {}]   ;;  %s3875_s1 = inlined_call_operand.vmem [shape: f32[128,32], index: 1, kind: input, shape index: {}]   ;;  %s3876_s2 = inlined_call_operand.vmem [shape: f32[32,3200], index: 2, kind: input, shape index: {}]   ;;  %s3877_s3 = inlined_call_operand.vmem [shape: f32[1,640], index: 3, kind: input, shape index: {}]   ;;  %s3878_s4 = inlined_call_operand.vmem [shape: f32[640,32], index: 4, kind: input, shape index: {}]   ;;  %s3879_s5 = inlined_call_operand.vmem [shape: f32[1,32], index: 5, kind: input, shape index: {}]   ;;  %s3880_s6 = inlined_call_operand.hbm [shape: f32[2,32], index: 6, kind: output, shape index: {}]  }
   0x1   :  { %v26_v0 = vld [vmem:[%s3874_s0 + $0x10] sm:$0xff]  ;;  %v24_v1 = vld [vmem:[%s3874_s0] sm:$0xff]  ;;  %2696 = vset.pattern.permute.xlu1 %v2723_v2  ;;  %2695 = vset.pattern.permute.xlu0 %v2723_v2  ;;  %v55_v4 = vld [vmem:[%s3875_s1 + $0x8] sm:$0xff] }
   0x2   :  { %v54_v3 = vld [vmem:[%s3875_s1] sm:$0xff]  ;;  %37 = vperm.xlu1 %2696, %v26_v0   ;;  %31 = vperm.xlu0 %2695, %v24_v1   ;;  %v27_v5 = vld [vmem:[%s3874_s0 + $0x18] sm:$0xff]  ;;  %v56_v7 = vld [vmem:[%s3875_s1 + $0x10] sm:$0xff] }
   0x3   :  { %v2461_v6 = vpack.c.bf16 %v55_v4, %v54_v3  ;;  %v57_v8 = vld [vmem:[%s3875_s1 + $0x18] sm:$0xff]  ;;  %v25_v9 = vld [vmem:[%s3874_s0 + $0x8] sm:$0xff]  ;;  %v58_v11 = vld [vmem:[%s3875_s1 + $0x20] sm:$0xff] }
   0x4   :  { %v2465_v10 = vpack.c.bf16 %v57_v8, %v56_v7  ;;  %v59_v12 = vld [vmem:[%s3875_s1 + $0x28] sm:$0xff] }
   0x5   :  { %2462 = vmatprep.subr.bf16.mxu0 %v2461_v6  ;;  %v2469_v13 = vpack.c.bf16 %v59_v12, %v58_v11 }
   0x6   :  { %2464 = vmatpush3.bf16.msra.mxu0 %v2461_v6  ;;  %40 = vperm.xlu1 %2696, %v27_v5  }
   0x7   :  { %34 = vperm.xlu0 %2695, %v25_v9  }
   0x8   :  { %11 = vsyncpa [#allocation3], 0  ;;  %2466 = vmatprep.subr.bf16.mxu0 %v2465_v10  ;;  %v60_v14 = vld [vmem:[%s3875_s1 + $0x30] sm:$0xff]  ;;  %v61_v15 = vld [vmem:[%s3875_s1 + $0x38] sm:$0xff]  ;;  %v28_v41 = vlaneseq  ;;  %v2724_v45 = vmov 1.0   ;;  %v2725_v51 = vmov 0.0  }
   0x9   :  { %v2473_v16 = vpack.c.bf16 %v61_v15, %v60_v14  ;;  %v62_v17 = vld [vmem:[%s3875_s1 + $0x40] sm:$0xff]  ;;  %v63_v18 = vld [vmem:[%s3875_s1 + $0x48] sm:$0xff]  ;;  %v181_v20 = vld [vmem:[%s3876_s2 + $0xd0] sm:$0xff]  ;;  %344 = vmatprep.mubr.f32.mxu1 %v2725_v51  ;;  %vm255_vm4 = vcmask 261120   ;;  %vm1828_vm12 = vcmask 1041409   ;;  %s2728_s27 = smov [#allocation2]  }
   0xa   :  { %2468 = vmatpush3.bf16.msra.mxu0 %v2465_v10  ;;  %v156_v19 = vld [vmem:[%s3876_s2 + $0x8] sm:$0xff]  ;;  %v155_v21 = vld [vmem:[%s3876_s2] sm:$0xff]  ;;  %v206_v24 = vld [vmem:[%s3876_s2 + $0x198] sm:$0xff]  ;;  %v2477_v27 = vpack.c.bf16 %v63_v18, %v62_v17  ;;  %v29_v42 = vand.u32 127, %v28_v41 }
   0xb   :  { %2470 = vmatprep.subr.bf16.mxu0 %v2469_v13  ;;  %v2493_v22 = vpack.c.bf16 %v181_v20, %v156_v19  ;;  %v180_v23 = vld [vmem:[%s3876_s2 + $0xc8] sm:$0xff]  ;;  %v231_v25 = vld [vmem:[%s3876_s2 + $0x260] sm:$0xff]  ;;  %v205_v29 = vld [vmem:[%s3876_s2 + $0x190] sm:$0xff] }
   0xc   :  { %v2495_v26 = vpack.c.bf16 %v180_v23, %v155_v21  ;;  %v2497_v28 = vpack.c.bf16 %v231_v25, %v206_v24  ;;  %v230_v30 = vld [vmem:[%s3876_s2 + $0x258] sm:$0xff]  ;;  %v64_v31 = vld [vmem:[%s3875_s1 + $0x50] sm:$0xff]  ;;  %v66_v35 = vld [vmem:[%s3875_s1 + $0x60] sm:$0xff] }
   0xd   :  { %2685 = vmatprep.subr.bf16.mxu1 %v2493_v22  ;;  %v65_v32 = vld [vmem:[%s3875_s1 + $0x58] sm:$0xff]  ;;  %v2499_v33 = vpack.c.bf16 %v230_v30, %v205_v29  ;;  %v67_v36 = vld [vmem:[%s3875_s1 + $0x68] sm:$0xff]  ;;  %v68_v38 = vld [vmem:[%s3875_s1 + $0x70] sm:$0xff] }
   0xe   :  { %2472 = vmatpush3.bf16.msra.mxu0 %v2469_v13  ;;  %2687 = vmatpush1.bf16.msra.mxu1 %v2495_v26  ;;  %v2481_v34 = vpack.c.bf16 %v65_v32, %v64_v31  ;;  %v2485_v37 = vpack.c.bf16 %v67_v36, %v66_v35  ;;  %v69_v39 = vld [vmem:[%s3875_s1 + $0x78] sm:$0xff]  ;;  %v160_v48 = vld [vmem:[%s3876_s2 + $0x28] sm:$0xff]  ;;  %v185_v49 = vld [vmem:[%s3876_s2 + $0xf0] sm:$0xff] }
   0xf   :  { %2474 = vmatprep.subr.bf16.mxu0 %v2473_v16  ;;  %2686 = vmatprep.subr.bf16.mxu1 %v2497_v28  ;;  %v2489_v40 = vpack.c.bf16 %v69_v39, %v68_v38  ;;  %v2509_v50 = vpack.c.bf16 %v185_v49, %v160_v48  ;;  %v158_v52 = vld [vmem:[%s3876_s2 + $0x18] sm:$0xff]  ;;  %v183_v53 = vld [vmem:[%s3876_s2 + $0xe0] sm:$0xff]  ;;  %v184_v56 = vld [vmem:[%s3876_s2 + $0xe8] sm:$0xff] }
  0x10   :  { %v2501_v54 = vpack.c.bf16 %v183_v53, %v158_v52  ;;  %v159_v55 = vld [vmem:[%s3876_s2 + $0x20] sm:$0xff]  ;;  %v210_v57 = vld [vmem:[%s3876_s2 + $0x1b8] sm:$0xff]  ;;  %v157_v60 = vld [vmem:[%s3876_s2 + $0x10] sm:$0xff] }
  0x11   :  { %v235_v58 = vld [vmem:[%s3876_s2 + $0x280] sm:$0xff]  ;;  %v2511_v59 = vpack.c.bf16 %v184_v56, %v159_v55  ;;  %v182_v62 = vld [vmem:[%s3876_s2 + $0xd8] sm:$0xff]  ;;  %v209_v0 = vld [vmem:[%s3876_s2 + $0x1b0] sm:$0xff] }
  0x12   :  { %2476 = vmatpush3.bf16.msra.mxu0 %v2473_v16  ;;  %2688 = vmatpush1.bf16.msra.mxu1 %v2499_v33  ;;  %v2513_v63 = vpack.c.bf16 %v235_v58, %v210_v57  ;;  %v234_v1 = vld [vmem:[%s3876_s2 + $0x278] sm:$0xff]  ;;  %v208_v3 = vld [vmem:[%s3876_s2 + $0x1a8] sm:$0xff]  ;;  %v233_v4 = vld [vmem:[%s3876_s2 + $0x270] sm:$0xff]  ;;  %v2503_v7 = vpack.c.bf16 %v182_v62, %v157_v60 }
  0x13   :  { %2478 = vmatprep.subr.bf16.mxu0 %v2477_v27  ;;  %2502 = vmatprep.subr.bf16.mxu1 %v2501_v54  ;;  %v164_v5 = vld [vmem:[%s3876_s2 + $0x48] sm:$0xff]  ;;  %v189_v6 = vld [vmem:[%s3876_s2 + $0x110] sm:$0xff]  ;;  %v2515_v8 = vpack.c.bf16 %v234_v1, %v209_v0  ;;  %v2505_v10 = vpack.c.bf16 %v233_v4, %v208_v3  ;;  %v207_v11 = vld [vmem:[%s3876_s2 + $0x1a0] sm:$0xff] }
  0x14   :  { %v232_v12 = vld [vmem:[%s3876_s2 + $0x268] sm:$0xff]  ;;  %v162_v14 = vld [vmem:[%s3876_s2 + $0x38] sm:$0xff]  ;;  %v187_v15 = vld [vmem:[%s3876_s2 + $0x100] sm:$0xff]  ;;  %v2525_v16 = vpack.c.bf16 %v189_v6, %v164_v5 }
  0x15   :  { %v163_v17 = vld [vmem:[%s3876_s2 + $0x40] sm:$0xff]  ;;  %v188_v18 = vld [vmem:[%s3876_s2 + $0x108] sm:$0xff]  ;;  %v2507_v19 = vpack.c.bf16 %v232_v12, %v207_v11  ;;  %v2517_v20 = vpack.c.bf16 %v187_v15, %v162_v14  ;;  %v161_v21 = vld [vmem:[%s3876_s2 + $0x30] sm:$0xff] }
  0x16   :  { %2480 = vmatpush3.bf16.msra.mxu0 %v2477_v27  ;;  %v2527_v23 = vpack.c.bf16 %v188_v18, %v163_v17  ;;  %v212_v24 = vld [vmem:[%s3876_s2 + $0x1c8] sm:$0xff]  ;;  %v237_v25 = vld [vmem:[%s3876_s2 + $0x290] sm:$0xff]  ;;  %v239_v27 = vld [vmem:[%s3876_s2 + $0x2a0] sm:$0xff] }
  0x17   :  { %2482 = vmatprep.subr.bf16.mxu0 %v2481_v34  ;;  %v2521_v29 = vpack.c.bf16 %v237_v25, %v212_v24  ;;  %v213_v30 = vld [vmem:[%s3876_s2 + $0x1d0] sm:$0xff]  ;;  %v238_v31 = vld [vmem:[%s3876_s2 + $0x298] sm:$0xff]  ;;  %v211_v32 = vld [vmem:[%s3876_s2 + $0x1c0] sm:$0xff] }
  0x18   :  { %v166_v35 = vld [vmem:[%s3876_s2 + $0x58] sm:$0xff]  ;;  %v191_v36 = vld [vmem:[%s3876_s2 + $0x120] sm:$0xff]  ;;  %v193_v38 = vld [vmem:[%s3876_s2 + $0x130] sm:$0xff] }
  0x19   :  { %v165_v48 = vld [vmem:[%s3876_s2 + $0x50] sm:$0xff]  ;;  %v190_v49 = vld [vmem:[%s3876_s2 + $0x118] sm:$0xff]  ;;  %v216_v52 = vld [vmem:[%s3876_s2 + $0x1e8] sm:$0xff] }
  0x1a   :  { %2484 = vmatpush3.bf16.msra.mxu0 %v2481_v34  ;;  %v241_v53 = vld [vmem:[%s3876_s2 + $0x2b0] sm:$0xff]  ;;  %v242_v56 = vld [vmem:[%s3876_s2 + $0x2b8] sm:$0xff]  ;;  %v2535_v57 = vpack.c.bf16 %v190_v49, %v165_v48  ;;  %v240_v60 = vld [vmem:[%s3876_s2 + $0x2a8] sm:$0xff] }
  0x1b   :  { %2486 = vmatprep.subr.bf16.mxu0 %v2485_v37  ;;  %v217_v55 = vld [vmem:[%s3876_s2 + $0x1f0] sm:$0xff]  ;;  %v2537_v58 = vpack.c.bf16 %v241_v53, %v216_v52  ;;  %v170_v1 = vld [vmem:[%s3876_s2 + $0x78] sm:$0xff]  ;;  %v195_v3 = vld [vmem:[%s3876_s2 + $0x140] sm:$0xff] }
  0x1c   :  { %v2547_v62 = vpack.c.bf16 %v242_v56, %v217_v55  ;;  %v197_v0 = vld [vmem:[%s3876_s2 + $0x150] sm:$0xff]  ;;  %v2549_v6 = vpack.c.bf16 %v195_v3, %v170_v1  ;;  %v247_v11 = vld [vmem:[%s3876_s2 + $0x2e0] sm:$0xff]  ;;  %v194_v14 = vld [vmem:[%s3876_s2 + $0x138] sm:$0xff] }
  0x1d   :  { %v169_v12 = vld [vmem:[%s3876_s2 + $0x70] sm:$0xff]  ;;  %v244_v24 = vld [vmem:[%s3876_s2 + $0x2c8] sm:$0xff]  ;;  %v223_v48 = vld [vmem:[%s3876_s2 + $0x220] sm:$0xff] }
  0x1e   :  { %2488 = vmatpush3.bf16.msra.mxu0 %v2485_v37  ;;  %v168_v37 = vld [vmem:[%s3876_s2 + $0x68] sm:$0xff]  ;;  %v245_v17 = vld [vmem:[%s3876_s2 + $0x2d0] sm:$0xff]  ;;  %v179_v52 = vld [vmem:[%s3876_s2 + $0xc0] sm:$0xff] }
  0x1f   :  { %2490 = vmatprep.subr.bf16.mxu0 %v2489_v40  ;;  %v248_v49 = vld [vmem:[%s3876_s2 + $0x2e8] sm:$0xff]  ;;  %v203_v55 = vld [vmem:[%s3876_s2 + $0x180] sm:$0xff]  ;;  %v253_v1 = vld [vmem:[%s3876_s2 + $0x310] sm:$0xff] }
  0x20   :  { %v204_v53 = vld [vmem:[%s3876_s2 + $0x188] sm:$0xff]  ;;  %v2571_v56 = vpack.c.bf16 %v248_v49, %v223_v48 }
  0x21   :  { %v1897_v48 = vld [vmem:[%s3878_s4 + $0x68] sm:$0xff] }
  0x22   :  { %2492 = vmatpush3.bf16.msra.mxu0 %v2489_v40  ;;  %v2531_v40 = vpack.c.bf16 %v238_v31, %v213_v30 }
  0x23   :  { %2494 = vmatprep.subr.bf16.mxu0 %v2493_v22  ;;  %v186_v22 = vld [vmem:[%s3876_s2 + $0xf8] sm:$0xff] }
  0x81   :  { %v38_v43 = vpop.permute.xlu1 %37  ;;  %v32_v44 = vpop.permute.xlu0 %31 }
  0x82   :  { %vm42_vm0 = vcmp.eq.s32.totalorder %v29_v42, %v32_v44  ;;  %vm44_vm1 = vcmp.eq.s32.totalorder %v29_v42, %v38_v43  ;;  %v2541_v43 = vpack.c.bf16 %v193_v38, %v168_v37  ;;  %v167_v44 = vld [vmem:[%s3876_s2 + $0x60] sm:$0xff]  ;;  %v173_v37 = vld [vmem:[%s3876_s2 + $0x90] sm:$0xff]  ;;  %v198_v38 = vld [vmem:[%s3876_s2 + $0x158] sm:$0xff] }
  0x83   :  { %2406 = vmatprep.mubr.msk.f32.mxu0 %vm42_vm0, %v2724_v45 }
  0x85   :  { %v41_v47 = vpop.permute.xlu1 %40 }
  0x86   :  { %v35_v46 = vpop.permute.xlu0 %34  ;;  %vm45_vm3 = vcmp.eq.s32.totalorder %v29_v42, %v41_v47  ;;  %v243_v47 = vld [vmem:[%s3876_s2 + $0x2c0] sm:$0xff] }
  0x87   :  { %vm43_vm2 = vcmp.eq.s32.totalorder %v29_v42, %v35_v46  ;;  %v2533_v42 = vpack.c.bf16 %v191_v36, %v166_v35  ;;  %v218_v46 = vld [vmem:[%s3876_s2 + $0x1f8] sm:$0xff]  ;;  %v251_v36 = vld [vmem:[%s3876_s2 + $0x300] sm:$0xff] }
  0x88   :  { %2407 = vmatmul.mubr.msk.f32.vlgmr.msra.gmra.mrb[0].mxu0 %vm43_vm2, %v2724_v45  ;;  %v2545_v54 = vpack.c.bf16 %v243_v47, %v218_v46  ;;  %v226_v35 = vld [vmem:[%s3876_s2 + $0x238] sm:$0xff]  ;;  %v2567_v46 = vpack.c.bf16 %v198_v38, %v173_v37  ;;  %v1910_v37 = vld [vmem:[%s3878_s4 + $0xd0] sm:$0xff]  ;;  %vm2727_vm2 = vmmov 0  }
  0x89   :  { %2409 = vmatprep.mubr.msk.f32.mxu0 %vm44_vm1, %v2724_v45  ;;  %2496 = vmatpush1.bf16.msra.mxu0 %v2495_v26  ;;  %v214_v26 = vld [vmem:[%s3876_s2 + $0x1d8] sm:$0xff] }
  0x8a   :  { %2498 = vmatprep.subr.bf16.mxu0 %v2497_v28  ;;  %v2519_v28 = vpack.c.bf16 %v186_v22, %v161_v21  ;;  %v2529_v34 = vpack.c.bf16 %v239_v27, %v214_v26  ;;  %v2551_v21 = vpack.c.bf16 %v194_v14, %v169_v12  ;;  %v176_v26 = vld [vmem:[%s3876_s2 + $0xa8] sm:$0xff]  ;;  %v201_v27 = vld [vmem:[%s3876_s2 + $0x170] sm:$0xff]  ;;  %v1903_v14 = vld [vmem:[%s3878_s4 + $0x98] sm:$0xff] }
  0x8b   :  { %v2573_v31 = vpack.c.bf16 %v201_v27, %v176_v26  ;;  %v1907_v26 = vld [vmem:[%s3878_s4 + $0xb8] sm:$0xff] }
  0x8c   :  { %2410 = vmatmul.mubr.msk.f32.gmra.mrb[2].mxu0 %vm45_vm3, %v2724_v45  ;;  %v192_v45 = vld [vmem:[%s3876_s2 + $0x128] sm:$0xff]  ;;  %v1911_v38 = vld [vmem:[%s3878_s4 + $0xd8] sm:$0xff] }
  0x8d   :  { %2500 = vmatpush1.bf16.msra.mxu0 %v2499_v33  ;;  %332 = vmatprep.mubr.f32.mxu0 %v2725_v51  ;;  %v236_v33 = vld [vmem:[%s3876_s2 + $0x288] sm:$0xff] }
  0x8e   :  { %2510 = vmatprep.subr.bf16.mxu0 %v2509_v50  ;;  %v2523_v39 = vpack.c.bf16 %v236_v33, %v211_v32  ;;  %v2543_v50 = vpack.c.bf16 %v192_v45, %v167_v44  ;;  %v175_v33 = vld [vmem:[%s3876_s2 + $0xa0] sm:$0xff]  ;;  %v225_v44 = vld [vmem:[%s3876_s2 + $0x230] sm:$0xff]  ;;  %v250_v45 = vld [vmem:[%s3876_s2 + $0x2f8] sm:$0xff] }
 0x15b   :  { %v2878_v61 = vpop.f32.mrb[0].mxu0 }
 0x15c   :  { %v2889_v2 = vpop.f32.mrb[1].mxu0 }
 0x15d   :  { %2206 = vmatmul.mubr.msk.f32.vlgmr.msra.gmra.mrb[4].mxu0 %vm255_vm4, %v2889_v2 }
 0x15e   :  { %2512 = vmatpush1.bf16.msra.mxu0 %v2511_v59  ;;  %338 = vmatprep.mubr.f32.mxu0 %v2725_v51  ;;  %v215_v59 = vld [vmem:[%s3876_s2 + $0x1e0] sm:$0xff] }
 0x15f   :  { %v2906_v9 = vpop.f32.mrb[2].mxu0  ;;  %2514 = vmatprep.subr.bf16.mxu0 %v2513_v63  ;;  %v172_v63 = vld [vmem:[%s3876_s2 + $0x88] sm:$0xff]  ;;  %v2539_v4 = vpack.c.bf16 %v240_v60, %v215_v59  ;;  %v229_v59 = vld [vmem:[%s3876_s2 + $0x250] sm:$0xff]  ;;  %v254_v60 = vld [vmem:[%s3876_s2 + $0x318] sm:$0xff] }
 0x160   :  { %v2914_v13 = vpop.f32.mrb[3].mxu0  ;;  %v2557_v5 = vpack.c.bf16 %v197_v0, %v172_v63  ;;  %v202_v63 = vld [vmem:[%s3876_s2 + $0x178] sm:$0xff]  ;;  %v228_v0 = vld [vmem:[%s3876_s2 + $0x248] sm:$0xff]  ;;  %v2593_v3 = vpack.c.bf16 %v254_v60, %v229_v59  ;;  %v1916_v60 = vld [vmem:[%s3878_s4 + $0x100] sm:$0xff] }
 0x161   :  { %2207 = vmatmul.mubr.msk.f32.gmra.mrb[6].mxu0 %vm255_vm4, %v2878_v61  ;;  %2208 = vmatmul.mubr.msk.f32.vlgmr.msra.gmra.mrb[0].mxu1 %vm255_vm4, %v2914_v13 }
 0x162   :  { %2504 = vmatpush1.bf16.msra.mxu1 %v2503_v7  ;;  %2516 = vmatpush1.bf16.msra.mxu0 %v2515_v8  ;;  %v171_v7 = vld [vmem:[%s3876_s2 + $0x80] sm:$0xff]  ;;  %v196_v8 = vld [vmem:[%s3876_s2 + $0x148] sm:$0xff] }
 0x163   :  { %350 = vmatprep.mubr.f32.mxu1 %v2725_v51  ;;  %2506 = vmatprep.subr.bf16.mxu1 %v2505_v10  ;;  %v222_v10 = vld [vmem:[%s3876_s2 + $0x218] sm:$0xff]  ;;  %v2559_v15 = vpack.c.bf16 %v196_v8, %v171_v7  ;;  %v252_v7 = vld [vmem:[%s3876_s2 + $0x308] sm:$0xff] }
 0x164   :  { %510 = vmatprep.mubr.f32.mxu0 %v2725_v51  ;;  %2526 = vmatprep.subr.bf16.mxu0 %v2525_v16  ;;  %v220_v16 = vld [vmem:[%s3876_s2 + $0x208] sm:$0xff]  ;;  %v2561_v18 = vpack.c.bf16 %v247_v11, %v222_v10 }
 0x165   :  { %2209 = vmatmul.mubr.msk.f32.gmra.mrb[2].mxu1 %vm255_vm4, %v2906_v9  ;;  %2214 = vmatmul.mubr.msk.f32.vlgmr.msra.gmra.mrb[8].mxu0 %vm255_vm4, %v2889_v2  ;;  %v2553_v22 = vpack.c.bf16 %v245_v17, %v220_v16  ;;  %v1901_v10 = vld [vmem:[%s3878_s4 + $0x88] sm:$0xff]  ;;  %v1886_v16 = vld [vmem:[%s3878_s4 + $0x10] sm:$0xff]  ;;  %v1887_v17 = vld [vmem:[%s3878_s4 + $0x18] sm:$0xff] }
 0x166   :  { %2508 = vmatpush1.bf16.msra.mxu1 %v2507_v19  ;;  %421 = vmatprep.mubr.f32.mxu1 %v2725_v51  ;;  %v221_v19 = vld [vmem:[%s3876_s2 + $0x210] sm:$0xff] }
 0x167   :  { %516 = vmatprep.mubr.f32.mxu0 %v2725_v51  ;;  %2518 = vmatprep.subr.bf16.mxu1 %v2517_v20  ;;  %v246_v20 = vld [vmem:[%s3876_s2 + $0x2d8] sm:$0xff] }
 0x168   :  { %2528 = vmatpush1.bf16.msra.mxu0 %v2527_v23  ;;  %v219_v23 = vld [vmem:[%s3876_s2 + $0x200] sm:$0xff]  ;;  %v2563_v25 = vpack.c.bf16 %v246_v20, %v221_v19  ;;  %v1905_v20 = vld [vmem:[%s3878_s4 + $0xa8] sm:$0xff] }
 0x169   :  { %2210 = vmatmul.mubr.msk.f32.vlgmr.msra.gmra.mrb[4].mxu1 %vm255_vm4, %v2889_v2  ;;  %2215 = vmatmul.mubr.msk.f32.gmra.mrb[10].mxu0 %vm255_vm4, %v2878_v61  ;;  %v2555_v30 = vpack.c.bf16 %v244_v24, %v219_v23  ;;  %v1904_v19 = vld [vmem:[%s3878_s4 + $0xa0] sm:$0xff]  ;;  %v1889_v23 = vld [vmem:[%s3878_s4 + $0x28] sm:$0xff] }
 0x16a   :  { %2520 = vmatpush1.bf16.msra.mxu1 %v2519_v28  ;;  %427 = vmatprep.mubr.f32.mxu1 %v2725_v51  ;;  %v174_v28 = vld [vmem:[%s3876_s2 + $0x98] sm:$0xff] }
 0x16b   :  { %522 = vmatprep.mubr.f32.mxu0 %v2725_v51  ;;  %2522 = vmatprep.subr.bf16.mxu1 %v2521_v29  ;;  %v199_v29 = vld [vmem:[%s3876_s2 + $0x160] sm:$0xff] }
 0x16c   :  { %2530 = vmatprep.subr.bf16.mxu0 %v2529_v34  ;;  %v2565_v32 = vpack.c.bf16 %v199_v29, %v174_v28  ;;  %v200_v34 = vld [vmem:[%s3876_s2 + $0x168] sm:$0xff]  ;;  %v1890_v28 = vld [vmem:[%s3878_s4 + $0x30] sm:$0xff]  ;;  %v1891_v29 = vld [vmem:[%s3878_s4 + $0x38] sm:$0xff] }
 0x16d   :  { %2211 = vmatmul.mubr.msk.f32.gmra.mrb[6].mxu1 %vm255_vm4, %v2878_v61  ;;  %2216 = vmatmul.mubr.msk.f32.gmra.mrb[12].mxu0 %vm255_vm4, %v2914_v13 }
 0x16e   :  { %433 = vmatprep.mubr.f32.mxu1 %v2725_v51  ;;  %528 = vmatprep.mubr.f32.mxu0 %v2725_v51 }
 0x16f   :  { %2524 = vmatpush1.bf16.msra.mxu1 %v2523_v39  ;;  %2532 = vmatpush1.bf16.msra.mxu0 %v2531_v40  ;;  %v2575_v39 = vpack.c.bf16 %v200_v34, %v175_v33  ;;  %v224_v40 = vld [vmem:[%s3876_s2 + $0x228] sm:$0xff]  ;;  %v1892_v34 = vld [vmem:[%s3878_s4 + $0x40] sm:$0xff] }
 0x170   :  { %2534 = vmatprep.subr.bf16.mxu1 %v2533_v42  ;;  %2542 = vmatprep.subr.bf16.mxu0 %v2541_v43  ;;  %v249_v42 = vld [vmem:[%s3876_s2 + $0x2f0] sm:$0xff]  ;;  %v2577_v43 = vpack.c.bf16 %v251_v36, %v226_v35  ;;  %v1893_v35 = vld [vmem:[%s3878_s4 + $0x48] sm:$0xff] }
 0x171   :  { %2212 = vmatmul.mubr.msk.f32.gmra.mrb[8].mxu1 %vm255_vm4, %v2914_v13  ;;  %2217 = vmatmul.mubr.msk.f32.gmra.mrb[14].mxu0 %vm255_vm4, %v2906_v9  ;;  %v2569_v47 = vpack.c.bf16 %v249_v42, %v224_v40  ;;  %v2615_v36 = vpack.c.bf16 %v1893_v35, %v1892_v34  ;;  %v1894_v40 = vld [vmem:[%s3878_s4 + $0x50] sm:$0xff]  ;;  %v1895_v42 = vld [vmem:[%s3878_s4 + $0x58] sm:$0xff] }
 0x172   :  { %439 = vmatprep.mubr.f32.mxu1 %v2725_v51  ;;  %688 = vmatprep.mubr.f32.mxu0 %v2725_v51  ;;  %v1946_v35 = vld [vmem:[%s3878_s4 + $0x1f0] sm:$0xff] }
 0x175   :  { %2213 = vmatmul.mubr.msk.f32.gmra.mrb[10].mxu1 %vm255_vm4, %v2906_v9  ;;  %2222 = vmatmul.mubr.msk.f32.vlgmr.msra.gmra.mrb[16].mxu0 %vm255_vm4, %v2889_v2 }
 0x176   :  { %599 = vmatprep.mubr.f32.mxu1 %v2725_v51  ;;  %694 = vmatprep.mubr.f32.mxu0 %v2725_v51 }
 0x177   :  { %2544 = vmatpush1.bf16.msra.mxu0 %v2543_v50  ;;  %v2579_v50 = vpack.c.bf16 %v250_v45, %v225_v44  ;;  %v1912_v44 = vld [vmem:[%s3878_s4 + $0xe0] sm:$0xff]  ;;  %v1913_v45 = vld [vmem:[%s3878_s4 + $0xe8] sm:$0xff] }
 0x178   :  { %2546 = vmatprep.subr.bf16.mxu0 %v2545_v54  ;;  %v178_v54 = vld [vmem:[%s3876_s2 + $0xb8] sm:$0xff] }
 0x179   :  { %2218 = vmatmul.mubr.msk.f32.vlgmr.msra.gmra.mrb[12].mxu1 %vm255_vm4, %v2889_v2  ;;  %2223 = vmatmul.mubr.msk.f32.gmra.mrb[18].mxu0 %vm255_vm4, %v2878_v61 }
 0x17a   :  { %2536 = vmatpush1.bf16.msra.mxu1 %v2535_v57  ;;  %605 = vmatprep.mubr.f32.mxu1 %v2725_v51  ;;  %v2589_v57 = vpack.c.bf16 %v204_v53, %v179_v52  ;;  %v1915_v52 = vld [vmem:[%s3878_s4 + $0xf8] sm:$0xff] }
 0x17b   :  { %700 = vmatprep.mubr.f32.mxu0 %v2725_v51  ;;  %2538 = vmatprep.subr.bf16.mxu1 %v2537_v58  ;;  %v2581_v58 = vpack.c.bf16 %v203_v55, %v178_v54  ;;  %v1898_v54 = vld [vmem:[%s3878_s4 + $0x70] sm:$0xff]  ;;  %v1899_v55 = vld [vmem:[%s3878_s4 + $0x78] sm:$0xff] }
 0x17c   :  { %2548 = vmatpush1.bf16.msra.mxu0 %v2547_v62  ;;  %v177_v62 = vld [vmem:[%s3876_s2 + $0xb0] sm:$0xff] }
 0x17d   :  { %2219 = vmatmul.mubr.msk.f32.gmra.mrb[14].mxu1 %vm255_vm4, %v2878_v61  ;;  %2224 = vmatmul.mubr.msk.f32.gmra.mrb[20].mxu0 %vm255_vm4, %v2914_v13 }
 0x17e   :  { %611 = vmatprep.mubr.f32.mxu1 %v2725_v51  ;;  %706 = vmatprep.mubr.f32.mxu0 %v2725_v51 }
 0x17f   :  { %2540 = vmatpush1.bf16.msra.mxu1 %v2539_v4  ;;  %2558 = vmatprep.subr.bf16.mxu0 %v2557_v5  ;;  %v2583_v4 = vpack.c.bf16 %v202_v63, %v177_v62  ;;  %v2585_v5 = vpack.c.bf16 %v253_v1, %v228_v0  ;;  %v1917_v62 = vld [vmem:[%s3878_s4 + $0x108] sm:$0xff]  ;;  %v1934_v0 = vld [vmem:[%s3878_s4 + $0x190] sm:$0xff]  ;;  %v1935_v1 = vld [vmem:[%s3878_s4 + $0x198] sm:$0xff] }
 0x180   :  { %2550 = vmatprep.subr.bf16.mxu1 %v2549_v6  ;;  %v227_v6 = vld [vmem:[%s3876_s2 + $0x240] sm:$0xff]  ;;  %v2631_v63 = vpack.c.bf16 %v1917_v62, %v1916_v60  ;;  %s2190_s2 = sshll.u32 %s2728_s27, 4  ;;  %s2191_s2 = int_to_ptr.vmem [resolvable:$true] %s2190_s2 }
 0x181   :  { %2220 = vmatmul.mubr.msk.f32.gmra.mrb[16].mxu1 %vm255_vm4, %v2914_v13  ;;  %2225 = vmatmul.mubr.msk.f32.gmra.mrb[22].mxu0 %vm255_vm4, %v2906_v9  ;;  %v2587_v8 = vpack.c.bf16 %v252_v7, %v227_v6  ;;  %v1936_v7 = vld [vmem:[%s3878_s4 + $0x1a0] sm:$0xff]  ;;  %s2699_s28 = scalar_lea.vmem %s2191_s2, 32  ;;  %p2704_p1 = scmp.lt.s32.totalorder %s2191_s2, %s2191_s2 }
 0x182   :  { %617 = vmatprep.mubr.f32.mxu1 %v2725_v51  ;;  %866 = vmatprep.mubr.f32.mxu0 %v2725_v51  ;;  %p2700_p0 = scmp.ne.s32.totalorder %s2191_s2, %s2699_s28  ;;  %p2705_p2 = scmp.lt.s32.totalorder %s2699_s28, %s2699_s28 }
 0x184   :  { %p2706_p3 = por %p2705_p2, %p2704_p1 }
 0x185   :  { %2221 = vmatmul.mubr.msk.f32.gmra.mrb[18].mxu1 %vm255_vm4, %v2906_v9  ;;  %2230 = vmatmul.mubr.msk.f32.vlgmr.msra.gmra.mrb[24].mxu0 %vm255_vm4, %v2889_v2 }
 0x186   :  { %777 = vmatprep.mubr.f32.mxu1 %v2725_v51  ;;  %872 = vmatprep.mubr.f32.mxu0 %v2725_v51  ;;  %p2707_p4 = pnand %p2706_p3, %p2700_p0 }
 0x187   :  { %2560 = vmatpush1.bf16.msra.mxu0 %v2559_v15 }
 0x188   :  { %2562 = vmatprep.subr.bf16.mxu0 %v2561_v18  ;;  %v2603_v18 = vpack.c.bf16 %v1887_v17, %v1886_v16  ;;  %v1940_v17 = vld [vmem:[%s3878_s4 + $0x1c0] sm:$0xff] }
 0x189   :  { %2226 = vmatmul.mubr.msk.f32.vlgmr.msra.gmra.mrb[20].mxu1 %vm255_vm4, %v2889_v2  ;;  %2231 = vmatmul.mubr.msk.f32.gmra.mrb[26].mxu0 %vm255_vm4, %v2878_v61 }
 0x18a   :  { %2552 = vmatpush1.bf16.msra.mxu1 %v2551_v21  ;;  %783 = vmatprep.mubr.f32.mxu1 %v2725_v51  ;;  %v2605_v21 = vpack.c.bf16 %v1905_v20, %v1904_v19  ;;  %v1924_v20 = vld [vmem:[%s3878_s4 + $0x140] sm:$0xff] }
 0x18b   :  { %878 = vmatprep.mubr.f32.mxu0 %v2725_v51  ;;  %2554 = vmatprep.subr.bf16.mxu1 %v2553_v22  ;;  %v1888_v22 = vld [vmem:[%s3878_s4 + $0x20] sm:$0xff] }
 0x18c   :  { %2564 = vmatpush1.bf16.msra.mxu0 %v2563_v25  ;;  %v2607_v24 = vpack.c.bf16 %v1889_v23, %v1888_v22  ;;  %v1906_v25 = vld [vmem:[%s3878_s4 + $0xb0] sm:$0xff] }
 0x18d   :  { %2227 = vmatmul.mubr.msk.f32.gmra.mrb[22].mxu1 %vm255_vm4, %v2878_v61  ;;  %2232 = vmatmul.mubr.msk.f32.gmra.mrb[28].mxu0 %vm255_vm4, %v2914_v13  ;;  %v2609_v27 = vpack.c.bf16 %v1907_v26, %v1906_v25  ;;  %v1942_v23 = vld [vmem:[%s3878_s4 + $0x1d0] sm:$0xff] }
 0x18e   :  { %789 = vmatprep.mubr.f32.mxu1 %v2725_v51  ;;  %884 = vmatprep.mubr.f32.mxu0 %v2725_v51  ;;  %v1926_v25 = vld [vmem:[%s3878_s4 + $0x150] sm:$0xff] }
 0x18f   :  { %2556 = vmatpush1.bf16.msra.mxu1 %v2555_v30  ;;  %2574 = vmatprep.subr.bf16.mxu0 %v2573_v31  ;;  %v2611_v30 = vpack.c.bf16 %v1891_v29, %v1890_v28  ;;  %v1908_v31 = vld [vmem:[%s3878_s4 + $0xc0] sm:$0xff] }
 0x190   :  { %2566 = vmatprep.subr.bf16.mxu1 %v2565_v32  ;;  %v1909_v32 = vld [vmem:[%s3878_s4 + $0xc8] sm:$0xff]  ;;  %v1944_v29 = vld [vmem:[%s3878_s4 + $0x1e0] sm:$0xff] }
 0x191   :  { %2228 = vmatmul.mubr.msk.f32.gmra.mrb[24].mxu1 %vm255_vm4, %v2914_v13  ;;  %2233 = vmatmul.mubr.msk.f32.gmra.mrb[30].mxu0 %vm255_vm4, %v2906_v9  ;;  %v2613_v33 = vpack.c.bf16 %v1909_v32, %v1908_v31  ;;  %v1928_v32 = vld [vmem:[%s3878_s4 + $0x160] sm:$0xff] }
 0x192   :  { %795 = vmatprep.mubr.f32.mxu1 %v2725_v51  ;;  %1044 = vmatprep.mubr.f32.mxu0 %v2725_v51 }
 0x195   :  { %2229 = vmatmul.mubr.msk.f32.gmra.mrb[26].mxu1 %vm255_vm4, %v2906_v9  ;;  %2238 = vmatmul.mubr.msk.f32.vlgmr.msra.gmra.mrb[32].mxu0 %vm255_vm4, %v2889_v2 }
 0x196   :  { %955 = vmatprep.mubr.f32.mxu1 %v2725_v51  ;;  %1050 = vmatprep.mubr.f32.mxu0 %v2725_v51 }
 0x197   :  { %2576 = vmatpush1.bf16.msra.mxu0 %v2575_v39  ;;  %v2617_v39 = vpack.c.bf16 %v1911_v38, %v1910_v37  ;;  %v1930_v38 = vld [vmem:[%s3878_s4 + $0x170] sm:$0xff] }
 0x198   :  { %2578 = vmatprep.subr.bf16.mxu0 %v2577_v43  ;;  %v2619_v43 = vpack.c.bf16 %v1895_v42, %v1894_v40  ;;  %v2726_v42 = vmov 0.0|0.0  }
 0x199   :  { %2234 = vmatmul.mubr.msk.f32.vlgmr.msra.gmra.mrb[28].mxu1 %vm255_vm4, %v2889_v2  ;;  %2239 = vmatmul.mubr.msk.f32.gmra.mrb[34].mxu0 %vm255_vm4, %v2878_v61 }
 0x19a   :  { %2568 = vmatpush1.bf16.msra.mxu1 %v2567_v46  ;;  %961 = vmatprep.mubr.f32.mxu1 %v2725_v51  ;;  %v2621_v46 = vpack.c.bf16 %v1913_v45, %v1912_v44  ;;  %v3479_v44 = vshrl.u32 %v28_v41, 7 }
 0x19b   :  { %1056 = vmatprep.mubr.f32.mxu0 %v2725_v51  ;;  %2570 = vmatprep.subr.bf16.mxu1 %v2569_v47  ;;  %v1896_v47 = vld [vmem:[%s3878_s4 + $0x60] sm:$0xff] }
 0x19c   :  { %2580 = vmatpush1.bf16.msra.mxu0 %v2579_v50  ;;  %v2623_v49 = vpack.c.bf16 %v1897_v48, %v1896_v47  ;;  %v1914_v50 = vld [vmem:[%s3878_s4 + $0xf0] sm:$0xff]  ;;  %vm1434_vm5 = vcmp.lt.s32.totalorder %v3479_v44, 7  ;;  %vm1447_vm6 = vcmp.lt.s32.totalorder %v3479_v44, 6  ;;  %vm1514_vm9 = vcmp.lt.s32.totalorder %v3479_v44, 5 }
 0x19d   :  { %2235 = vmatmul.mubr.msk.f32.gmra.mrb[30].mxu1 %vm255_vm4, %v2878_v61  ;;  %2240 = vmatmul.mubr.msk.f32.gmra.mrb[36].mxu0 %vm255_vm4, %v2914_v13  ;;  %v2625_v53 = vpack.c.bf16 %v1915_v52, %v1914_v50  ;;  %vm1593_vm13 = vcmp.lt.s32.totalorder %v3479_v44, 4  ;;  %vm1684_vm0 = vcmp.lt.s32.totalorder %v3479_v44, 3 }
 0x19e   :  { %967 = vmatprep.mubr.f32.mxu1 %v2725_v51  ;;  %1062 = vmatprep.mubr.f32.mxu0 %v2725_v51 }
 0x19f   :  { %2572 = vmatpush1.bf16.msra.mxu1 %v2571_v56  ;;  %2590 = vmatprep.subr.bf16.mxu0 %v2589_v57  ;;  %v2627_v56 = vpack.c.bf16 %v1899_v55, %v1898_v54 }
 0x1a0   :  { %2582 = vmatprep.subr.bf16.mxu1 %v2581_v58  ;;  %v1933_v58 = vld [vmem:[%s3878_s4 + $0x188] sm:$0xff] }
 0x1a1   :  { %2236 = vmatmul.mubr.msk.f32.gmra.mrb[32].mxu1 %vm255_vm4, %v2914_v13  ;;  %2241 = vmatmul.mubr.msk.f32.gmra.mrb[38].mxu0 %vm255_vm4, %v2906_v9 }
 0x1a2   :  { %973 = vmatprep.mubr.f32.mxu1 %v2725_v51  ;;  %1222 = vmatprep.mubr.f32.mxu0 %v2725_v51 }
 0x1a5   :  { %2237 = vmatmul.mubr.msk.f32.gmra.mrb[34].mxu1 %vm255_vm4, %v2906_v9  ;;  %2246 = vmatmul.mubr.msk.f32.vlgmr.msra.gmra.mrb[40].mxu0 %vm255_vm4, %v2889_v2 }
 0x1a6   :  { %1133 = vmatprep.mubr.f32.mxu1 %v2725_v51  ;;  %1228 = vmatprep.mubr.f32.mxu0 %v2725_v51 }
 0x1a7   :  { %2592 = vmatpush3.bf16.msra.mxu0 %v2589_v57  ;;  %v1932_v57 = vld [vmem:[%s3878_s4 + $0x180] sm:$0xff] }
 0x1a8   :  { %2594 = vmatprep.subr.bf16.mxu0 %v2593_v3  ;;  %v2629_v59 = vpack.c.bf16 %v1933_v58, %v1932_v57 }
 0x1a9   :  { %2242 = vmatmul.mubr.msk.f32.vlgmr.msra.gmra.mrb[36].mxu1 %vm255_vm4, %v2889_v2  ;;  %2247 = vmatmul.mubr.msk.f32.gmra.mrb[42].mxu0 %vm255_vm4, %v2878_v61 }
 0x1aa   :  { %2584 = vmatpush1.bf16.msra.mxu1 %v2583_v4  ;;  %1139 = vmatprep.mubr.f32.mxu1 %v2725_v51  ;;  %v1918_v4 = vld [vmem:[%s3878_s4 + $0x110] sm:$0xff] }
 0x1ab   :  { %1234 = vmatprep.mubr.f32.mxu0 %v2725_v51  ;;  %2586 = vmatprep.subr.bf16.mxu1 %v2585_v5  ;;  %v1919_v5 = vld [vmem:[%s3878_s4 + $0x118] sm:$0xff] }
 0x1ac   :  { %2596 = vmatpush3.bf16.msra.mxu0 %v2593_v3  ;;  %v2633_v3 = vpack.c.bf16 %v1935_v1, %v1934_v0  ;;  %v2635_v6 = vpack.c.bf16 %v1919_v5, %v1918_v4 }
 0x1ad   :  { %2243 = vmatmul.mubr.msk.f32.gmra.mrb[38].mxu1 %vm255_vm4, %v2878_v61  ;;  %2248 = vmatmul.mubr.msk.f32.gmra.mrb[44].mxu0 %vm255_vm4, %v2914_v13 }
 0x1ae   :  { %1145 = vmatprep.mubr.f32.mxu1 %v2725_v51  ;;  %1240 = vmatprep.mubr.f32.mxu0 %v2725_v51 }
 0x1af   :  { %2588 = vmatpush1.bf16.msra.mxu1 %v2587_v8  ;;  %2630 = vmatprep.subr.bf16.mxu0 %v2629_v59  ;;  %v1937_v8 = vld [vmem:[%s3878_s4 + $0x1a8] sm:$0xff] }
 0x1b1   :  { %2244 = vmatmul.mubr.msk.f32.gmra.mrb[40].mxu1 %vm255_vm4, %v2914_v13  ;;  %2249 = vmatmul.mubr.msk.f32.gmra.mrb[46].mxu0 %vm255_vm4, %v2906_v9 }
 0x1b2   :  { %2420 = vmatprep.mubr.msk.f32.mxu0 %vm255_vm4, %v2889_v2  ;;  %1151 = vmatprep.mubr.f32.mxu1 %v2725_v51 }
 0x1b5   :  { %2245 = vmatmul.mubr.msk.f32.gmra.mrb[42].mxu1 %vm255_vm4, %v2906_v9  ;;  %2421 = vmatmul.mubr.msk.f32.vlgmr.msra.gmra.mrb[48].mxu0 %vm255_vm4, %v2878_v61 }
 0x1b6   :  { %2423 = vmatprep.mubr.msk.f32.mxu0 %vm255_vm4, %v2914_v13  ;;  %1311 = vmatprep.mubr.f32.mxu1 %v2725_v51 }
 0x1b7   :  { %2632 = vmatpush3.bf16.msra.mxu0 %v2631_v63 }
 0x1b8   :  { %2634 = vmatprep.subr.bf16.mxu0 %v2633_v3 }
 0x1b9   :  { %2250 = vmatmul.mubr.msk.f32.vlgmr.msra.gmra.mrb[44].mxu1 %vm255_vm4, %v2889_v2  ;;  %2424 = vmatmul.mubr.msk.f32.gmra.mrb[50].mxu0 %vm255_vm4, %v2906_v9  ;;  %v1900_v2 = vld [vmem:[%s3878_s4 + $0x80] sm:$0xff] }
 0x1ba   :  { %1317 = vmatprep.mubr.f32.mxu1 %v2725_v51  ;;  %v2597_v11 = vpack.c.bf16 %v1901_v10, %v1900_v2  ;;  %v2637_v2 = vpack.c.bf16 %v1937_v8, %v1936_v7  ;;  %v1920_v10 = vld [vmem:[%s3878_s4 + $0x120] sm:$0xff] }
 0x1bb   :  { %2636 = vmatpush3.bf16.msra.mxu0 %v2635_v6 }
 0x1bc   :  { %2598 = vmatprep.subr.bf16.mxu1 %v2597_v11  ;;  %v1921_v11 = vld [vmem:[%s3878_s4 + $0x128] sm:$0xff]  ;;  %2638 = vmatprep.subr.bf16.mxu0 %v2637_v2 }
 0x1bd   :  { %2251 = vmatmul.mubr.msk.f32.gmra.mrb[46].mxu1 %vm255_vm4, %v2878_v61  ;;  %v1884_v61 = vld [vmem:[%s3878_s4] sm:$0xff] }
 0x1be   :  { %1323 = vmatprep.mubr.f32.mxu1 %v2725_v51 }
 0x1c1   :  { %2252 = vmatmul.mubr.msk.f32.gmra.mrb[48].mxu1 %vm255_vm4, %v2914_v13  ;;  %v1885_v13 = vld [vmem:[%s3878_s4 + $0x8] sm:$0xff] }
 0x1c2   :  { %1329 = vmatprep.mubr.f32.mxu1 %v2725_v51  ;;  %v2599_v12 = vpack.c.bf16 %v1885_v13, %v1884_v61  ;;  %v2639_v61 = vpack.c.bf16 %v1921_v11, %v1920_v10  ;;  %v1938_v13 = vld [vmem:[%s3878_s4 + $0x1b0] sm:$0xff] }
 0x1c4   :  { %2600 = vmatpush3.bf16.msra.mxu1 %v2599_v12  ;;  %2640 = vmatpush3.bf16.msra.mxu0 %v2639_v61  ;;  %v1939_v12 = vld [vmem:[%s3878_s4 + $0x1b8] sm:$0xff]  ;;  %v1423_v61 = vadd.s32 8, %v3479_v44 }
 0x1c5   :  { %2253 = vmatmul.mubr.msk.f32.gmra.mrb[50].mxu1 %vm255_vm4, %v2906_v9  ;;  %v1902_v9 = vld [vmem:[%s3878_s4 + $0x90] sm:$0xff]  ;;  %vm1787_vm4 = vcmp.lt.s32.totalorder %v3479_v44, 2 }
 0x1c6   :  { %v2601_v15 = vpack.c.bf16 %v1903_v14, %v1902_v9  ;;  %v2641_v9 = vpack.c.bf16 %v1939_v12, %v1938_v13  ;;  %v1922_v14 = vld [vmem:[%s3878_s4 + $0x130] sm:$0xff] }
 0x1c8   :  { %2602 = vmatprep.subr.bf16.mxu1 %v2601_v15  ;;  %v1923_v15 = vld [vmem:[%s3878_s4 + $0x138] sm:$0xff]  ;;  %2642 = vmatprep.subr.bf16.mxu0 %v2641_v9 }
 0x1c9   :  { %2604 = vmatpush3.bf16.msra.mxu1 %v2603_v18  ;;  %v2643_v16 = vpack.c.bf16 %v1923_v15, %v1922_v14  ;;  %v1941_v18 = vld [vmem:[%s3878_s4 + $0x1c8] sm:$0xff] }
 0x1ca   :  { %2606 = vmatprep.subr.bf16.mxu1 %v2605_v21  ;;  %v2645_v19 = vpack.c.bf16 %v1941_v18, %v1940_v17  ;;  %v1925_v21 = vld [vmem:[%s3878_s4 + $0x148] sm:$0xff] }
 0x1cb   :  { %2644 = vmatpush3.bf16.msra.mxu0 %v2643_v16  ;;  %v2647_v22 = vpack.c.bf16 %v1925_v21, %v1924_v20 }
 0x1cc   :  { %2646 = vmatprep.subr.bf16.mxu0 %v2645_v19 }
 0x1cd   :  { %2608 = vmatpush3.bf16.msra.mxu1 %v2607_v24  ;;  %v1943_v24 = vld [vmem:[%s3878_s4 + $0x1d8] sm:$0xff] }
 0x1ce   :  { %2610 = vmatprep.subr.bf16.mxu1 %v2609_v27  ;;  %v2649_v26 = vpack.c.bf16 %v1943_v24, %v1942_v23  ;;  %v1927_v27 = vld [vmem:[%s3878_s4 + $0x158] sm:$0xff]  ;;  %v3498_v23 = vand.u32 15, %v1423_v61 }
 0x1cf   :  { %2648 = vmatpush3.bf16.msra.mxu0 %v2647_v22  ;;  %v2651_v28 = vpack.c.bf16 %v1927_v27, %v1926_v25 }
 0x1d0   :  { %2650 = vmatprep.subr.bf16.mxu0 %v2649_v26  ;;  %v1425_v26 = vadd.s32 24, %v3479_v44  ;;  %vm1457_vm7 = vcmp.lt.s32.totalorder %v3498_v23, 14  ;;  %vm1524_vm10 = vcmp.lt.s32.totalorder %v3498_v23, 13  ;;  %vm1603_vm14 = vcmp.lt.s32.totalorder %v3498_v23, 12 }
 0x1d1   :  { %2612 = vmatpush3.bf16.msra.mxu1 %v2611_v30  ;;  %v1945_v30 = vld [vmem:[%s3878_s4 + $0x1e8] sm:$0xff]  ;;  %vm1694_vm1 = vcmp.lt.s32.totalorder %v3498_v23, 11 }
 0x1d2   :  { %2614 = vmatprep.subr.bf16.mxu1 %v2613_v33  ;;  %v2653_v31 = vpack.c.bf16 %v1945_v30, %v1944_v29  ;;  %v1929_v33 = vld [vmem:[%s3878_s4 + $0x168] sm:$0xff] }
 0x1d3   :  { %2652 = vmatpush3.bf16.msra.mxu0 %v2651_v28  ;;  %v2655_v34 = vpack.c.bf16 %v1929_v33, %v1928_v32 }
 0x1d4   :  { %2654 = vmatprep.subr.bf16.mxu0 %v2653_v31 }
 0x1d5   :  { %2616 = vmatpush3.bf16.msra.mxu1 %v2615_v36  ;;  %v1947_v36 = vld [vmem:[%s3878_s4 + $0x1f8] sm:$0xff] }
 0x1d6   :  { %2618 = vmatprep.subr.bf16.mxu1 %v2617_v39  ;;  %v2657_v37 = vpack.c.bf16 %v1947_v36, %v1946_v35  ;;  %v1931_v39 = vld [vmem:[%s3878_s4 + $0x178] sm:$0xff] }
 0x1d7   :  { %2656 = vmatpush3.bf16.msra.mxu0 %v2655_v34  ;;  %v2659_v40 = vpack.c.bf16 %v1931_v39, %v1930_v38 }
 0x1d8   :  { %2658 = vmatprep.subr.bf16.mxu0 %v2657_v37 }
 0x1d9   :  { %2620 = vmatpush3.bf16.msra.mxu1 %v2619_v43 }
 0x1da   :  { %2622 = vmatprep.subr.bf16.mxu1 %v2621_v46 }
 0x1db   :  { %2660 = vmatpush3.bf16.msra.mxu0 %v2659_v40  ;;  %v3514_v40 = vand.u32 15, %v1425_v26 }
 0x1dd   :  { %2624 = vmatpush3.bf16.msra.mxu1 %v2623_v49  ;;  %vm1459_vm8 = vcmp.lt.s32.totalorder %v3514_v40, 14  ;;  %vm1526_vm11 = vcmp.lt.s32.totalorder %v3514_v40, 13  ;;  %vm1605_vm15 = vcmp.lt.s32.totalorder %v3514_v40, 12  ;;  %vm1696_vm3 = vcmp.lt.s32.totalorder %v3514_v40, 11 }
 0x1de   :  { %2626 = vmatprep.subr.bf16.mxu1 %v2625_v53 }
 0x1e1   :  { %2628 = vmatpush3.bf16.msra.mxu1 %v2627_v56 }
 0x1e2   :  { %2661 = vmatprep.subr.bf16.mxu1 %v2726_v42 }
 0x230   :  { %v334_v43 = vpop.f32.mrb[4].mxu0 }
 0x231   :  { %v336_v45 = vpop.f32.mrb[5].mxu0 }
 0x232   :  { %v1430_v50 = vrot.slane %v336_v45, 1 }
 0x234   :  { %v340_v46 = vpop.f32.mrb[6].mxu0  ;;  %v346_v47 = vpop.f32.mrb[0].mxu1 }
 0x235   :  { %v342_v48 = vpop.f32.mrb[7].mxu0  ;;  %v348_v49 = vpop.f32.mrb[1].mxu1 }
 0x236   :  { %v1431_v52 = vrot.slane %v342_v48, 1  ;;  %v1432_v53 = vrot.slane %v348_v49, 1 }
 0x238   :  { %v1437_v54 = vsel %vm1434_vm5, %v1430_v50, %v1431_v52  ;;  %v1436_v55 = vsel %vm1434_vm5, %v1431_v52, %v1432_v53  ;;  %v352_v56 = vpop.f32.mrb[2].mxu1  ;;  %v512_v57 = vpop.f32.mrb[8].mxu0 }
 0x239   :  { %v1439_v41 = vadd.f32 %v1437_v54, %v334_v43  ;;  %v1440_v58 = vadd.f32 %v1436_v55, %v340_v46  ;;  %v354_v59 = vpop.f32.mrb[3].mxu1  ;;  %v514_v60 = vpop.f32.mrb[9].mxu0  ;;  %v1486_v4 = vrot.slane %v512_v57, 1 }
 0x23a   :  { %v1433_v62 = vrot.slane %v354_v59, 1  ;;  %v1498_v10 = vrot.slane %v514_v60, 2 }
 0x23c   :  { %v1435_v63 = vsel %vm1434_vm5, %v1432_v53, %v1433_v62  ;;  %v1438_v0 = vsel %vm1434_vm5, %v1433_v62, %v1430_v50  ;;  %v423_v1 = vpop.f32.mrb[4].mxu1  ;;  %v518_v3 = vpop.f32.mrb[10].mxu0 }
 0x23d   :  { %v1441_v5 = vadd.f32 %v1435_v63, %v346_v47  ;;  %v1442_v6 = vadd.f32 %v1438_v0, %v352_v56  ;;  %v1487_v7 = vrot.slane %v518_v3, 1  ;;  %v425_v8 = vpop.f32.mrb[5].mxu1  ;;  %v520_v2 = vpop.f32.mrb[11].mxu0  ;;  %v1443_v16 = vrot.slane %v423_v1, 2 }
 0x23e   :  { %v1499_v11 = vrot.slane %v520_v2, 2 }
 0x23f   :  { %v1492_v13 = vsel %vm1434_vm5, %v1486_v4, %v1487_v7 }
 0x240   :  { %v1494_v12 = vadd.f32 %v1492_v13, %v425_v8  ;;  %v1504_v9 = vsel %vm1447_vm6, %v1498_v10, %v1499_v11  ;;  %v429_v14 = vpop.f32.mrb[6].mxu1  ;;  %v524_v15 = vpop.f32.mrb[12].mxu0 }
 0x241   :  { %v1444_v17 = vrot.slane %v429_v14, 2  ;;  %v1488_v18 = vrot.slane %v524_v15, 1  ;;  %v431_v19 = vpop.f32.mrb[7].mxu1  ;;  %v526_v20 = vpop.f32.mrb[13].mxu0 }
 0x242   :  { %v3496_v21 = vadd.f32 %v1504_v9, %v1494_v12  ;;  %v1500_v22 = vrot.slane %v526_v20, 2 }
 0x243   :  { %v1450_v24 = vsel %vm1447_vm6, %v1443_v16, %v1444_v17  ;;  %v1491_v25 = vsel %vm1434_vm5, %v1487_v7, %v1488_v18 }
 0x244   :  { %v1452_v27 = vadd.f32 %v1450_v24, %v1439_v41  ;;  %v1495_v28 = vadd.f32 %v1491_v25, %v431_v19  ;;  %v1503_v29 = vsel %vm1447_vm6, %v1499_v11, %v1500_v22  ;;  %v435_v30 = vpop.f32.mrb[8].mxu1  ;;  %v530_v31 = vpop.f32.mrb[14].mxu0 }
 0x245   :  { %v1445_v32 = vrot.slane %v435_v30, 2  ;;  %v1489_v33 = vrot.slane %v530_v31, 1  ;;  %v437_v34 = vpop.f32.mrb[9].mxu1  ;;  %v532_v35 = vpop.f32.mrb[15].mxu0 }
 0x246   :  { %v3507_v36 = vadd.f32 %v1503_v29, %v1495_v28  ;;  %v1501_v37 = vrot.slane %v532_v35, 2 }
 0x247   :  { %v1449_v38 = vsel %vm1447_vm6, %v1444_v17, %v1445_v32  ;;  %v1490_v39 = vsel %vm1434_vm5, %v1488_v18, %v1489_v33  ;;  %v1493_v43 = vsel %vm1434_vm5, %v1489_v33, %v1486_v4 }
 0x248   :  { %v1453_v45 = vadd.f32 %v1449_v38, %v1440_v58  ;;  %v1496_v46 = vadd.f32 %v1490_v39, %v437_v34  ;;  %v1502_v47 = vsel %vm1447_vm6, %v1500_v22, %v1501_v37  ;;  %v441_v48 = vpop.f32.mrb[10].mxu1  ;;  %v3520_v49 = vpop.f32.mrb[16].mxu0  ;;  %v1505_v50 = vsel %vm1447_vm6, %v1501_v37, %v1498_v10 }
 0x249   :  { %v1446_v52 = vrot.slane %v441_v48, 2  ;;  %v443_v53 = vpop.f32.mrb[11].mxu1  ;;  %v3524_v54 = vpop.f32.mrb[17].mxu0  ;;  %v1553_v4 = vrot.slane %v3520_v49, 1 }
 0x24a   :  { %v1469_v55 = vsel %vm1457_vm7, %v1453_v45, -1e+30  ;;  %v3526_v56 = vadd.f32 %v1502_v47, %v1496_v46  ;;  %v1497_v57 = vadd.f32 %v1493_v43, %v443_v53  ;;  %v1565_v11 = vrot.slane %v3524_v54, 2 }
 0x24b   :  { %v1472_v41 = vmax.f32 %v1452_v27, %v1469_v55  ;;  %v1448_v58 = vsel %vm1447_vm6, %v1445_v32, %v1446_v52  ;;  %v1451_v59 = vsel %vm1447_vm6, %v1446_v52, %v1443_v16  ;;  %vm2182_vm7 = vcmask 254976  }
 0x24c   :  { %v1454_v60 = vadd.f32 %v1448_v58, %v1441_v5  ;;  %v1455_v62 = vadd.f32 %v1451_v59, %v1442_v6  ;;  %v3533_v63 = vadd.f32 %v1505_v50, %v1497_v57  ;;  %v3535_v0 = vpop.f32.mrb[12].mxu1  ;;  %v696_v1 = vpop.f32.mrb[18].mxu0 }
 0x24d   :  { %v1473_v3 = vrot.slane %v1472_v41, 4  ;;  %v1554_v7 = vrot.slane %v696_v1, 1  ;;  %v603_v8 = vpop.f32.mrb[13].mxu1  ;;  %v698_v2 = vpop.f32.mrb[19].mxu0  ;;  %v1510_v6 = vrot.slane %v3535_v0, 3 }
 0x24e   :  { %v1471_v10 = vsel %vm1459_vm8, %v1455_v62, -1e+30  ;;  %v1566_v61 = vrot.slane %v698_v2, 2 }
 0x24f   :  { %v1474_v13 = vmax.f32 %v1472_v41, %v1473_v3  ;;  %v1479_v12 = vmax.f32 %v1454_v60, %v1471_v10  ;;  %v1559_v5 = vsel %vm1434_vm5, %v1553_v4, %v1554_v7 }
 0x250   :  { %v1561_v9 = vadd.f32 %v1559_v5, %v603_v8  ;;  %v1571_v14 = vsel %vm1447_vm6, %v1565_v11, %v1566_v61  ;;  %v607_v15 = vpop.f32.mrb[14].mxu1  ;;  %v702_v16 = vpop.f32.mrb[20].mxu0 }
 0x251   :  { %v1475_v17 = vrot.slane %v1474_v13, 2  ;;  %v1480_v18 = vrot.slane %v1479_v12, 4  ;;  %v1511_v19 = vrot.slane %v607_v15, 3  ;;  %v1555_v20 = vrot.slane %v702_v16, 1  ;;  %v609_v22 = vpop.f32.mrb[15].mxu1  ;;  %v704_v24 = vpop.f32.mrb[21].mxu0 }
 0x252   :  { %v3545_v25 = vadd.f32 %v1571_v14, %v1561_v9  ;;  %v1567_v26 = vrot.slane %v704_v24, 2 }
 0x253   :  { %v1476_v27 = vmax.f32 %v1474_v13, %v1475_v17  ;;  %v1481_v28 = vmax.f32 %v1479_v12, %v1480_v18  ;;  %v1517_v29 = vsel %vm1514_vm9, %v1510_v6, %v1511_v19  ;;  %v1558_v30 = vsel %vm1434_vm5, %v1554_v7, %v1555_v20 }
 0x254   :  { %v1519_v31 = vadd.f32 %v1517_v29, %v3496_v21  ;;  %v1562_v32 = vadd.f32 %v1558_v30, %v609_v22  ;;  %v1570_v33 = vsel %vm1447_vm6, %v1566_v61, %v1567_v26  ;;  %v613_v34 = vpop.f32.mrb[16].mxu1  ;;  %v708_v35 = vpop.f32.mrb[22].mxu0 }
 0x255   :  { %v1482_v37 = vrot.slane %v1481_v28, 2  ;;  %v1512_v38 = vrot.slane %v613_v34, 3  ;;  %v1556_v39 = vrot.slane %v708_v35, 1  ;;  %v615_v43 = vpop.f32.mrb[17].mxu1  ;;  %v710_v45 = vpop.f32.mrb[23].mxu0  ;;  %v1477_v46 = vrot.slane %v1476_v27, 1 }
 0x256   :  { %v3554_v47 = vadd.f32 %v1570_v33, %v1562_v32  ;;  %v1568_v48 = vrot.slane %v710_v45, 2 }
 0x257   :  { %v1483_v49 = vmax.f32 %v1481_v28, %v1482_v37  ;;  %v1516_v21 = vsel %vm1514_vm9, %v1511_v19, %v1512_v38  ;;  %v1557_v50 = vsel %vm1434_vm5, %v1555_v20, %v1556_v39  ;;  %v1560_v41 = vsel %vm1434_vm5, %v1556_v39, %v1553_v4 }
 0x258   :  { %v1520_v52 = vadd.f32 %v1516_v21, %v3507_v36  ;;  %v1563_v53 = vadd.f32 %v1557_v50, %v615_v43  ;;  %v1569_v54 = vsel %vm1447_vm6, %v1567_v26, %v1568_v48  ;;  %v619_v55 = vpop.f32.mrb[18].mxu1  ;;  %v868_v57 = vpop.f32.mrb[24].mxu0  ;;  %v1572_v62 = vsel %vm1447_vm6, %v1568_v48, %v1565_v11  ;;  %v3598_v26 = vld [vmem:[%s3877_s3] sm:$0x1f] }
 0x259   :  { %v1484_v58 = vrot.slane %v1483_v49, 1  ;;  %v1513_v59 = vrot.slane %v619_v55, 3  ;;  %v621_v60 = vpop.f32.mrb[19].mxu1  ;;  %v3569_v0 = vpop.f32.mrb[25].mxu0  ;;  %v1478_v1 = vmax.f32 %v1476_v27, %v1477_v46 }
 0x25a   :  { %v1536_v36 = vsel %vm1524_vm10, %v1520_v52, -1e+30  ;;  %v3573_v3 = vadd.f32 %v1569_v54, %v1563_v53  ;;  %v1564_v7 = vadd.f32 %v1560_v41, %v621_v60 }
 0x25b   :  { %v1485_v8 = vmax.f32 %v1483_v49, %v1484_v58  ;;  %v1539_v2 = vmax.f32 %v1519_v31, %v1536_v36  ;;  %v1515_v4 = vsel %vm1514_vm9, %v1512_v38, %v1513_v59  ;;  %v1518_v10 = vsel %vm1514_vm9, %v1513_v59, %v1510_v6 }
 0x25c   :  { %v1521_v11 = vadd.f32 %v1515_v4, %v3526_v56  ;;  %v1522_v61 = vadd.f32 %v1518_v10, %v3533_v63  ;;  %v3581_v13 = vadd.f32 %v1572_v62, %v1564_v7  ;;  %v3583_v12 = vpop.f32.mrb[20].mxu1  ;;  %v874_v5 = vpop.f32.mrb[26].mxu0  ;;  %v1632_v6 = vrot.slane %v3569_v0, 1  ;;  %v3623_v0 = vld [vmem:[%s3878_s4 + $0x200] sm:$0xff] }
 0x25d   :  { %v1540_v9 = vrot.slane %v1539_v2, 4  ;;  %v3585_v14 = vpop.f32.mrb[21].mxu1  ;;  %v876_v15 = vpop.f32.mrb[27].mxu0  ;;  %v1829_v16 = vsel %vm1828_vm12, %v1485_v8, %v1478_v1  ;;  %v1851_v63 = vsub.s32 0, %v3479_v44  ;;  %v1577_v28 = vrot.slane %v3583_v12, 3  ;;  %v3628_v1 = vld [vmem:[%s3878_s4 + $0x208] sm:$0xff] }
 0x25e   :  { %v1538_v17 = vsel %vm1526_vm11, %v1522_v61, -1e+30  ;;  %v1633_v18 = vrot.slane %v876_v15, 1  ;;  %v1589_v33 = vrot.slane %v3585_v14, 4 }
 0x25f   :  { %v1541_v56 = vmax.f32 %v1539_v2, %v1540_v9  ;;  %v1546_v19 = vmax.f32 %v1521_v11, %v1538_v17  ;;  %v1852_v43 = vrot.slane %v3598_v26, %v1851_v63 }
 0x260   :  { %v1638_v20 = vsel %vm1434_vm5, %v1632_v6, %v1633_v18  ;;  %v785_v22 = vpop.f32.mrb[22].mxu1  ;;  %v880_v24 = vpop.f32.mrb[28].mxu0 }
 0x261   :  { %v1547_v27 = vrot.slane %v1546_v19, 4  ;;  %v3601_v29 = vadd.f32 %v1638_v20, %v868_v57  ;;  %v1578_v30 = vrot.slane %v785_v22, 3  ;;  %v787_v31 = vpop.f32.mrb[23].mxu1  ;;  %v882_v32 = vpop.f32.mrb[29].mxu0  ;;  %v1542_v37 = vrot.slane %v1541_v56, 2 }
 0x262   :  { %v1590_v34 = vrot.slane %v787_v31, 4  ;;  %v1634_v35 = vrot.slane %v882_v32, 1  ;;  %v1855_v57 = vsub.s32 1, %v3479_v44  ;;  %v3646_v17 = vadd.f32 %v1852_v43, %v1829_v16 }
 0x263   :  { %v1548_v38 = vmax.f32 %v1546_v19, %v1547_v27  ;;  %v1583_v39 = vsel %vm1514_vm9, %v1577_v28, %v1578_v30  ;;  %v1543_v60 = vmax.f32 %v1541_v56, %v1542_v37 }
 0x264   :  { %v1585_v45 = vadd.f32 %v1583_v39, %v3545_v25  ;;  %v1596_v46 = vsel %vm1593_vm13, %v1589_v33, %v1590_v34  ;;  %v1637_v48 = vsel %vm1434_vm5, %v1633_v18, %v1634_v35  ;;  %v791_v49 = vpop.f32.mrb[24].mxu1  ;;  %v886_v21 = vpop.f32.mrb[30].mxu0 }
 0x265   :  { %v1549_v50 = vrot.slane %v1548_v38, 2  ;;  %v3613_v52 = vadd.f32 %v1637_v48, %v874_v5  ;;  %v1579_v53 = vrot.slane %v791_v49, 3  ;;  %v793_v54 = vpop.f32.mrb[25].mxu1  ;;  %v888_v55 = vpop.f32.mrb[31].mxu0  ;;  %v1544_v19 = vrot.slane %v1543_v60, 1 }
 0x266   :  { %v1598_v41 = vadd.f32 %v1596_v46, %v1585_v45  ;;  %v1591_v25 = vrot.slane %v793_v54, 4  ;;  %v1635_v58 = vrot.slane %v888_v55, 1  ;;  %v1879_v48 = vmax.f32 %v3646_v17, 0.0 }
 0x267   :  { %v1582_v59 = vsel %vm1514_vm9, %v1578_v30, %v1579_v53  ;;  %v1550_v62 = vmax.f32 %v1548_v38, %v1549_v50  ;;  %v1545_v54 = vmax.f32 %v1543_v60, %v1544_v19 }
 0x268   :  { %v1586_v36 = vadd.f32 %v1582_v59, %v3554_v47  ;;  %v1595_v7 = vsel %vm1593_vm13, %v1590_v34, %v1591_v25  ;;  %v1636_v8 = vsel %vm1434_vm5, %v1634_v35, %v1635_v58  ;;  %v1639_v2 = vsel %vm1434_vm5, %v1635_v58, %v1632_v6  ;;  %v797_v4 = vpop.f32.mrb[26].mxu1  ;;  %v3637_v10 = vpop.f32.mrb[32].mxu0 }
 0x269   :  { %v3639_v11 = vadd.f32 %v1636_v8, %v880_v24  ;;  %v3641_v61 = vadd.f32 %v1639_v2, %v886_v21  ;;  %v1580_v12 = vrot.slane %v797_v4, 3  ;;  %v799_v5 = vpop.f32.mrb[27].mxu1  ;;  %v3643_v9 = vpop.f32.mrb[33].mxu0  ;;  %v1856_v47 = vrot.slane %v3598_v26, %v1855_v57 }
 0x26a   :  { %v1599_v14 = vadd.f32 %v1595_v7, %v1586_v36  ;;  %v1592_v15 = vrot.slane %v799_v5, 4  ;;  %v2662_v6 = vpack.c.bf16 %v3628_v1, %v3623_v0  ;;  %v1551_v63 = vrot.slane %v1550_v62, 1 }
 0x26b   :  { %v1581_v18 = vsel %vm1514_vm9, %v1579_v53, %v1580_v12  ;;  %v1584_v56 = vsel %vm1514_vm9, %v1580_v12, %v1577_v28  ;;  %v1668_v32 = vrot.slane %v3637_v10, 4 }
 0x26c   :  { %v1615_v20 = vsel %vm1603_vm14, %v1599_v14, -1e+30  ;;  %v1587_v22 = vadd.f32 %v1581_v18, %v3573_v3  ;;  %v1588_v24 = vadd.f32 %v1584_v56, %v3581_v13  ;;  %v1594_v16 = vsel %vm1593_vm13, %v1591_v25, %v1592_v15  ;;  %v3660_v27 = vpop.f32.mrb[28].mxu1  ;;  %v1052_v30 = vpop.f32.mrb[34].mxu0 }
 0x26d   :  { %v1618_v31 = vmax.f32 %v1598_v41, %v1615_v20  ;;  %v1597_v28 = vsel %vm1593_vm13, %v1592_v15, %v1589_v33  ;;  %v1669_v34 = vrot.slane %v1052_v30, 4  ;;  %v3665_v35 = vpop.f32.mrb[29].mxu1  ;;  %v1054_v37 = vpop.f32.mrb[35].mxu0  ;;  %v1680_v13 = vrot.slane %v3643_v9, 5 }
 0x26e   :  { %v1600_v38 = vadd.f32 %v1594_v16, %v1587_v22  ;;  %v1601_v3 = vadd.f32 %v1597_v28, %v1588_v24  ;;  %v1681_v39 = vrot.slane %v1054_v37, 5  ;;  %v1552_v46 = vmax.f32 %v1550_v62, %v1551_v63  ;;  %v1950_v37 = vld [vmem:[%s3878_s4 + $0x210] sm:$0xff] }
 0x26f   :  { %v1619_v43 = vrot.slane %v1618_v31, 4  ;;  %v1674_v45 = vsel %vm1593_vm13, %v1668_v32, %v1669_v34  ;;  %v1644_v33 = vrot.slane %v3660_v27, 2  ;;  %v1656_v62 = vrot.slane %v3665_v35, 3  ;;  %v1954_v27 = vld [vmem:[%s3878_s4 + $0x230] sm:$0xff] }
 0x270   :  { %v1617_v49 = vsel %vm1605_vm15, %v1601_v3, -1e+30  ;;  %v1687_v21 = vsel %vm1684_vm0, %v1680_v13, %v1681_v39  ;;  %v963_v50 = vpop.f32.mrb[30].mxu1  ;;  %v1058_v53 = vpop.f32.mrb[36].mxu0  ;;  %v1833_v8 = vsel %vm1828_vm12, %v1552_v46, %v1545_v54 }
 0x271   :  { %v1620_v55 = vmax.f32 %v1618_v31, %v1619_v43  ;;  %v1625_v57 = vmax.f32 %v1600_v38, %v1617_v49  ;;  %v1645_v41 = vrot.slane %v963_v50, 2  ;;  %v1670_v25 = vrot.slane %v1058_v53, 4  ;;  %v965_v58 = vpop.f32.mrb[31].mxu1  ;;  %v1060_v59 = vpop.f32.mrb[37].mxu0  ;;  %v1951_v38 = vld [vmem:[%s3878_s4 + $0x218] sm:$0xff]  ;;  %v1952_v53 = vld [vmem:[%s3878_s4 + $0x220] sm:$0xff] }
 0x272   :  { %v1657_v36 = vrot.slane %v965_v58, 3  ;;  %v1682_v7 = vrot.slane %v1060_v59, 5  ;;  %v1875_v14 = vadd.f32 %v1856_v47, %v1833_v8  ;;  %v2665_v59 = vpack.c.bf16 %v1951_v38, %v1950_v37 }
 0x273   :  { %v1621_v2 = vrot.slane %v1620_v55, 2  ;;  %v1626_v4 = vrot.slane %v1625_v57, 4  ;;  %v1650_v10 = vsel %vm1447_vm6, %v1644_v33, %v1645_v41  ;;  %v1673_v60 = vsel %vm1593_vm13, %v1669_v34, %v1670_v25 }
 0x274   :  { %v1652_v12 = vadd.f32 %v1650_v10, %v3601_v29  ;;  %v1662_v5 = vsel %vm1514_vm9, %v1656_v62, %v1657_v36  ;;  %v1686_v9 = vsel %vm1684_vm0, %v1681_v39, %v1682_v7  ;;  %v969_v15 = vpop.f32.mrb[32].mxu1  ;;  %v1064_v17 = vpop.f32.mrb[38].mxu0  ;;  %v1880_v16 = vmax.f32 %v1875_v14, 0.0 }
 0x275   :  { %v1622_v18 = vmax.f32 %v1620_v55, %v1621_v2  ;;  %v1627_v56 = vmax.f32 %v1625_v57, %v1626_v4  ;;  %v1646_v19 = vrot.slane %v969_v15, 2  ;;  %v1671_v63 = vrot.slane %v1064_v17, 4  ;;  %v971_v20 = vpop.f32.mrb[33].mxu1  ;;  %v1066_v22 = vpop.f32.mrb[39].mxu0 }
 0x276   :  { %v1664_v24 = vadd.f32 %v1662_v5, %v1652_v12  ;;  %v1658_v29 = vrot.slane %v971_v20, 3  ;;  %v1683_v30 = vrot.slane %v1066_v22, 5  ;;  %2035 = vmatprep.mubr.f32.mxu1 %v1880_v16 }
 0x277   :  { %v1623_v31 = vrot.slane %v1622_v18, 1  ;;  %v1628_v28 = vrot.slane %v1627_v56, 2  ;;  %v1649_v34 = vsel %vm1447_vm6, %v1645_v41, %v1646_v19  ;;  %v1672_v47 = vsel %vm1593_vm13, %v1670_v25, %v1671_v63  ;;  %2036 = vmatmul.mubr.f32.vlgmr.msra.gmra.mrb[52].mxu1 %v1879_v48 }
 0x278   :  { %v1676_v3 = vadd.f32 %v1674_v45, %v1664_v24  ;;  %v1653_v39 = vadd.f32 %v1649_v34, %v3613_v52  ;;  %v1675_v43 = vsel %vm1593_vm13, %v1671_v63, %v1668_v32  ;;  %v1661_v46 = vsel %vm1514_vm9, %v1657_v36, %v1658_v29  ;;  %v975_v49 = vpop.f32.mrb[34].mxu1  ;;  %v3706_v50 = vpop.f32.mrb[40].mxu0  ;;  %v1953_v45 = vld [vmem:[%s3878_s4 + $0x228] sm:$0xff]  ;;  %2663 = vmatpush3.bf16.msra.mxu1 %v2662_v6 }
 0x279   :  { %v1629_v54 = vmax.f32 %v1627_v56, %v1628_v28  ;;  %v1685_v52 = vsel %vm1684_vm0, %v1682_v7, %v1683_v30  ;;  %v1688_v32 = vsel %vm1684_vm0, %v1683_v30, %v1680_v13  ;;  %v977_v55 = vpop.f32.mrb[35].mxu1  ;;  %v3719_v57 = vpop.f32.mrb[41].mxu0  ;;  %v1647_v58 = vrot.slane %v975_v49, 2  ;;  %2458 = vmatprep.mubr.msk.f32.mxu1 %vm2727_vm2, %v2725_v51  ;;  %2664 = vmatprep.subr.bf16.mxu1 %v2726_v42 }
 0x27a   :  { %v1689_v41 = vadd.f32 %v1687_v21, %v1676_v3  ;;  %v1665_v25 = vadd.f32 %v1661_v46, %v1653_v39  ;;  %v1624_v48 = vmax.f32 %v1622_v18, %v1623_v31  ;;  %v1659_v7 = vrot.slane %v977_v55, 3 }
 0x27b   :  { %v1630_v36 = vrot.slane %v1629_v54, 1  ;;  %v2668_v13 = vpack.c.bf16 %v1953_v45, %v1952_v53  ;;  %v1648_v21 = vsel %vm1447_vm6, %v1646_v19, %v1647_v58  ;;  %v1651_v0 = vsel %vm1447_vm6, %v1647_v58, %v1644_v33  ;;  %v1955_v33 = vld [vmem:[%s3878_s4 + $0x238] sm:$0xff] }
 0x27c   :  { %v1677_v8 = vadd.f32 %v1673_v60, %v1665_v25  ;;  %v1735_v1 = vrot.slane %v3706_v50, 2  ;;  %v1135_v6 = vpop.f32.mrb[36].mxu1  ;;  %v1230_v2 = vpop.f32.mrb[42].mxu0  ;;  %v1654_v4 = vadd.f32 %v1648_v21, %v3639_v11  ;;  %v1655_v10 = vadd.f32 %v1651_v0, %v3641_v61  ;;  %2666 = vmatpush3.bf16.msra.mxu1 %v2665_v59 }
 0x27d   :  { %v1631_v51 = vmax.f32 %v1629_v54, %v1630_v36  ;;  %v1660_v60 = vsel %vm1514_vm9, %v1658_v29, %v1659_v7  ;;  %v3737_v12 = vpop.f32.mrb[37].mxu1  ;;  %v1232_v5 = vpop.f32.mrb[43].mxu0  ;;  %v1663_v11 = vsel %vm1514_vm9, %v1659_v7, %v1656_v62  ;;  %v1747_v61 = vrot.slane %v3719_v57, 3  ;;  %2667 = vmatprep.subr.bf16.mxu1 %v2726_v42 }
 0x27e   :  { %v1690_v14 = vadd.f32 %v1686_v9, %v1677_v8  ;;  %v1736_v15 = vrot.slane %v1230_v2, 2  ;;  %v1666_v17 = vadd.f32 %v1660_v60, %v1654_v4  ;;  %v1667_v18 = vadd.f32 %v1663_v11, %v1655_v10  ;;  %v1959_v8 = vld [vmem:[%s3878_s4 + $0x258] sm:$0xff] }
 0x27f   :  { %v1748_v56 = vrot.slane %v1232_v5, 3  ;;  %v3751_v19 = vsel %vm1828_vm12, %v1631_v51, %v1624_v48  ;;  %v2671_v20 = vpack.c.bf16 %v1955_v33, %v1954_v27  ;;  %v1723_v28 = vrot.slane %v3737_v12, 1 }
 0x280   :  { %v1706_v9 = vsel %vm1694_vm1, %v1690_v14, -1e+30  ;;  %v1741_v35 = vsel %vm1447_vm6, %v1735_v1, %v1736_v15  ;;  %v1141_v62 = vpop.f32.mrb[38].mxu1  ;;  %v1236_v63 = vpop.f32.mrb[44].mxu0  ;;  %v1678_v24 = vadd.f32 %v1672_v47, %v1666_v17  ;;  %v1679_v16 = vadd.f32 %v1675_v43, %v1667_v18  ;;  %2669 = vmatpush3.bf16.msra.mxu1 %v2668_v13  ;;  %v1956_v47 = vld [vmem:[%s3878_s4 + $0x240] sm:$0xff]  ;;  %v1957_v43 = vld [vmem:[%s3878_s4 + $0x248] sm:$0xff] }
 0x281   :  { %v1709_v22 = vmax.f32 %v1689_v41, %v1706_v9  ;;  %v1753_v29 = vsel %vm1514_vm9, %v1747_v61, %v1748_v56  ;;  %v1143_v30 = vpop.f32.mrb[39].mxu1  ;;  %v1238_v31 = vpop.f32.mrb[45].mxu0  ;;  %v1737_v34 = vrot.slane %v1236_v63, 2  ;;  %2670 = vmatprep.subr.bf16.mxu1 %v2726_v42  ;;  %v2674_v7 = vpack.c.bf16 %v1957_v43, %v1956_v47  ;;  %v1958_v13 = vld [vmem:[%s3878_s4 + $0x250] sm:$0xff] }
 0x282   :  { %v1724_v37 = vrot.slane %v1143_v30, 1  ;;  %v1749_v38 = vrot.slane %v1238_v31, 3  ;;  %v1691_v39 = vadd.f32 %v1685_v52, %v1678_v24  ;;  %v1692_v46 = vadd.f32 %v1688_v32, %v1679_v16 }
 0x283   :  { %v1710_v3 = vrot.slane %v1709_v22, 4  ;;  %v1740_v49 = vsel %vm1447_vm6, %v1736_v15, %v1737_v34  ;;  %v2677_v11 = vpack.c.bf16 %v1959_v8, %v1958_v13 }
 0x284   :  { %v1729_v53 = vsel %vm1434_vm5, %v1723_v28, %v1724_v37  ;;  %v1752_v45 = vsel %vm1514_vm9, %v1748_v56, %v1749_v38  ;;  %v1147_v54 = vpop.f32.mrb[40].mxu1  ;;  %v1242_v52 = vpop.f32.mrb[46].mxu0  ;;  %v1708_v32 = vsel %vm1696_vm3, %v1692_v46, -1e+30  ;;  %2672 = vmatpush3.bf16.msra.mxu1 %v2671_v20 }
 0x285   :  { %v1731_v55 = vadd.f32 %v1729_v53, %v1135_v6  ;;  %v1738_v57 = vrot.slane %v1242_v52, 2  ;;  %v1149_v41 = vpop.f32.mrb[41].mxu1  ;;  %v1244_v25 = vpop.f32.mrb[47].mxu0  ;;  %v1711_v58 = vmax.f32 %v1709_v22, %v1710_v3  ;;  %v1716_v59 = vmax.f32 %v1691_v39, %v1708_v32  ;;  %2673 = vmatprep.subr.bf16.mxu1 %v2726_v42  ;;  %v1963_v32 = vld [vmem:[%s3878_s4 + $0x278] sm:$0xff] }
 0x286   :  { %v1725_v48 = vrot.slane %v1149_v41, 1  ;;  %v1750_v36 = vrot.slane %v1244_v25, 3  ;;  %v1863_v3 = vsub.s32 3, %v3479_v44 }
 0x287   :  { %v1743_v21 = vadd.f32 %v1741_v35, %v1731_v55  ;;  %v1739_v0 = vsel %vm1447_vm6, %v1737_v34, %v1738_v57  ;;  %v1742_v6 = vsel %vm1447_vm6, %v1738_v57, %v1735_v1  ;;  %v1712_v2 = vrot.slane %v1711_v58, 2 }
 0x288   :  { %v1717_v51 = vrot.slane %v1716_v59, 4  ;;  %v1728_v4 = vsel %vm1434_vm5, %v1724_v37, %v1725_v48  ;;  %v1751_v10 = vsel %vm1514_vm9, %v1749_v38, %v1750_v36  ;;  %v1754_v60 = vsel %vm1514_vm9, %v1750_v36, %v1747_v61  ;;  %v1153_v12 = vpop.f32.mrb[42].mxu1  ;;  %v2422_v5 = vpop.f32.mrb[48].mxu0  ;;  %2675 = vmatpush3.bf16.msra.mxu1 %v2674_v7  ;;  %v1960_v61 = vld [vmem:[%s3878_s4 + $0x260] sm:$0xff] }
 0x289   :  { %v1732_v27 = vadd.f32 %v1728_v4, %v1141_v62  ;;  %v1784_v50 = vrot.slane %v2422_v5, 6  ;;  %v1155_v33 = vpop.f32.mrb[43].mxu1  ;;  %v1402_v14 = vpop.f32.mrb[49].mxu0  ;;  %v1755_v1 = vadd.f32 %v1753_v29, %v1743_v21  ;;  %v1713_v18 = vmax.f32 %v1711_v58, %v1712_v2  ;;  %2676 = vmatprep.subr.bf16.mxu1 %v2726_v42  ;;  %v1961_v62 = vld [vmem:[%s3878_s4 + $0x268] sm:$0xff] }
 0x28a   :  { %v1726_v15 = vrot.slane %v1155_v33, 1  ;;  %v1783_v17 = vrot.slane %v1402_v14, 6  ;;  %v1718_v56 = vmax.f32 %v1716_v59, %v1717_v51  ;;  %v1859_v35 = vsub.s32 2, %v3479_v44 }
 0x28b   :  { %v1744_v9 = vadd.f32 %v1740_v49, %v1732_v27  ;;  %v1714_v47 = vrot.slane %v1713_v18, 1  ;;  %v1864_v21 = vrot.slane %v3598_v26, %v1863_v3  ;;  %vm1799_vm6 = vcmp.lt.s32.totalorder %v3514_v40, 10 }
 0x28c   :  { %v1727_v63 = vsel %vm1434_vm5, %v1725_v48, %v1726_v15  ;;  %v1730_v20 = vsel %vm1434_vm5, %v1726_v15, %v1723_v28  ;;  %v1790_v22 = vsel %vm1787_vm4, %v1783_v17, %v1784_v50  ;;  %v3813_v24 = vpop.f32.mrb[44].mxu1  ;;  %v2425_v16 = vpop.f32.mrb[50].mxu0  ;;  %v1719_v29 = vrot.slane %v1718_v56, 2  ;;  %2678 = vmatpush3.bf16.msra.mxu1 %v2677_v11 }
 0x28d   :  { %v1733_v30 = vadd.f32 %v1727_v63, %v1147_v54  ;;  %v1734_v31 = vadd.f32 %v1730_v20, %v1153_v12  ;;  %v1786_v34 = vrot.slane %v2425_v16, 6  ;;  %v3815_v37 = vpop.f32.mrb[45].mxu1  ;;  %v1412_v38 = vpop.f32.mrb[51].mxu0  ;;  %v1756_v46 = vadd.f32 %v1752_v45, %v1744_v9  ;;  %2679 = vmatprep.subr.bf16.mxu1 %v2726_v42  ;;  %v1962_v54 = vld [vmem:[%s3878_s4 + $0x270] sm:$0xff] }
 0x28e   :  { %v1785_v39 = vrot.slane %v1412_v38, 6  ;;  %v2680_v28 = vpack.c.bf16 %v1961_v62, %v1960_v61  ;;  %v1720_v52 = vmax.f32 %v1718_v56, %v1719_v29  ;;  %v1759_v45 = vrot.slane %v3813_v24, 4 }
 0x28f   :  { %v1745_v43 = vadd.f32 %v1739_v0, %v1733_v30  ;;  %v1746_v49 = vadd.f32 %v1742_v6, %v1734_v31  ;;  %v1791_v53 = vsel %vm1787_vm4, %v1786_v34, %v1783_v17  ;;  %v1860_v25 = vrot.slane %v3598_v26, %v1859_v35 }
 0x290   :  { %v1788_v55 = vsel %vm1787_vm4, %v1785_v39, %v1786_v34  ;;  %v1789_v57 = vsel %vm1787_vm4, %v1784_v50, %v1785_v39  ;;  %v1319_v41 = vpop.f32.mrb[46].mxu1  ;;  %v1721_v7 = vrot.slane %v1720_v52, 1  ;;  %v1771_v13 = vrot.slane %v3815_v37, 5  ;;  %2681 = vmatpush3.bf16.msra.mxu1 %v2680_v28 }
 0x291   :  { %v1760_v58 = vrot.slane %v1319_v41, 4  ;;  %v1321_v59 = vpop.f32.mrb[47].mxu1  ;;  %v1757_v48 = vadd.f32 %v1751_v10, %v1745_v43  ;;  %v1758_v36 = vadd.f32 %v1754_v60, %v1746_v49  ;;  %v2683_v0 = vpack.c.bf16 %v1963_v32, %v1962_v54  ;;  %2682 = vmatprep.subr.bf16.mxu1 %v2726_v42 }
 0x292   :  { %v1772_v8 = vrot.slane %v1321_v59, 5  ;;  %v1715_v2 = vmax.f32 %v1713_v18, %v1714_v47  ;;  %v1722_v51 = vmax.f32 %v1720_v52, %v1721_v7  ;;  %v1876_v50 = vadd.f32 %v1860_v25, %v3751_v19 }
 0x293   :  { %v1765_v6 = vsel %vm1593_vm13, %v1759_v45, %v1760_v58  ;;  %vm1797_vm5 = vcmp.lt.s32.totalorder %v3498_v23, 10 }
 0x294   :  { %v1767_v4 = vadd.f32 %v1765_v6, %v1755_v1  ;;  %v1777_v10 = vsel %vm1684_vm0, %v1771_v13, %v1772_v8  ;;  %v1325_v60 = vpop.f32.mrb[48].mxu1  ;;  %v1841_v27 = vsel %vm1828_vm12, %v1722_v51, %v1715_v2  ;;  %2684 = vmatpush3.bf16.msra.mxu1 %v2683_v0  ;;  %v1881_v61 = vmax.f32 %v1876_v50, 0.0 }
 0x295   :  { %v1761_v12 = vrot.slane %v1325_v60, 4  ;;  %v1327_v5 = vpop.f32.mrb[49].mxu1  ;;  %v1877_v11 = vadd.f32 %v1864_v21, %v1841_v27 }
 0x296   :  { %v1779_v33 = vadd.f32 %v1777_v10, %v1767_v4  ;;  %v1773_v14 = vrot.slane %v1327_v5, 5 }
 0x297   :  { %v1764_v15 = vsel %vm1593_vm13, %v1760_v58, %v1761_v12  ;;  %v1882_v56 = vmax.f32 %v1877_v11, 0.0 }
 0x298   :  { %v1792_v17 = vadd.f32 %v1790_v22, %v1779_v33  ;;  %v1768_v42 = vadd.f32 %v1764_v15, %v1756_v46  ;;  %v1776_v1 = vsel %vm1684_vm0, %v1772_v8, %v1773_v14  ;;  %v1331_v18 = vpop.f32.mrb[50].mxu1  ;;  %v2258_v8 = vld [vmem:[%s3879_s5] ss:$0 sm:$0xff] }
 0x299   :  { %v1762_v9 = vrot.slane %v1331_v18, 4  ;;  %v1333_v35 = vpop.f32.mrb[51].mxu1  ;;  %2105 = vmatprep.mubr.f32.mxu0 %v1882_v56 }
 0x29a   :  { %v1780_v62 = vadd.f32 %v1776_v1, %v1768_v42  ;;  %v1774_v19 = vrot.slane %v1333_v35, 5  ;;  %2106 = vmatmul.mubr.f32.vlgmr.msra.gmra.mrb[52].mxu0 %v1881_v61 }
 0x29b   :  { %v1763_v63 = vsel %vm1593_vm13, %v1761_v12, %v1762_v9  ;;  %v1766_v20 = vsel %vm1593_vm13, %v1762_v9, %v1759_v45  ;;  %v1867_v45 = vsub.s32 4, %v3479_v44 }
 0x29c   :  { %v1793_v22 = vadd.f32 %v1789_v57, %v1780_v62  ;;  %v1769_v24 = vadd.f32 %v1763_v63, %v1757_v48  ;;  %v1770_v16 = vadd.f32 %v1766_v20, %v1758_v36  ;;  %v1775_v29 = vsel %vm1684_vm0, %v1773_v14, %v1774_v19 }
 0x29d   :  { %v1778_v30 = vsel %vm1684_vm0, %v1774_v19, %v1771_v13  ;;  %v1868_v58 = vrot.slane %v3598_v26, %v1867_v45 }
 0x29e   :  { %v1809_v31 = vsel %vm1797_vm5, %v1793_v22, -1e+30  ;;  %v1781_v34 = vadd.f32 %v1775_v29, %v1769_v24  ;;  %v1782_v37 = vadd.f32 %v1778_v30, %v1770_v16 }
 0x29f   :  { %v1812_v23 = vmax.f32 %v1792_v17, %v1809_v31 }
 0x2a0   :  { %v1794_v38 = vadd.f32 %v1788_v55, %v1781_v34  ;;  %v1795_v3 = vadd.f32 %v1791_v53, %v1782_v37 }
 0x2a1   :  { %v1813_v39 = vrot.slane %v1812_v23, 4 }
 0x2a2   :  { %v1811_v46 = vsel %vm1799_vm6, %v1795_v3, -1e+30 }
 0x2a3   :  { %v1814_v47 = vmax.f32 %v1812_v23, %v1813_v39  ;;  %v1819_v28 = vmax.f32 %v1794_v38, %v1811_v46 }
 0x2a5   :  { %v1815_v43 = vrot.slane %v1814_v47, 2  ;;  %v1820_v49 = vrot.slane %v1819_v28, 4 }
 0x2a7   :  { %v1816_v52 = vmax.f32 %v1814_v47, %v1815_v43  ;;  %v1821_v54 = vmax.f32 %v1819_v28, %v1820_v49 }
 0x2a9   :  { %v1822_v32 = vrot.slane %v1821_v54, 2  ;;  %v1817_v41 = vrot.slane %v1816_v52, 1 }
 0x2ab   :  { %v1823_v57 = vmax.f32 %v1821_v54, %v1822_v32  ;;  %v1818_v59 = vmax.f32 %v1816_v52, %v1817_v41 }
 0x2ad   :  { %v1824_v25 = vrot.slane %v1823_v57, 1 }
 0x2af   :  { %v1825_v40 = vmax.f32 %v1823_v57, %v1824_v25 }
 0x2b1   :  { %v1845_v53 = vsel %vm1828_vm12, %v1825_v40, %v1818_v59 }
 0x2b2   :  { %v1878_v55 = vadd.f32 %v1868_v58, %v1845_v53 }
 0x2b4   :  { %v1883_v48 = vmax.f32 %v1878_v55, 0.0 }
 0x2b6   :  { %2459 = vmatmul.mubr.f32.vlgmr.msra.gmra.mrb[54].mxu1 %v1883_v48 }
 0x34a   :  { %v2319_v36 = vpop.f32.mrb[52].mxu1 }
 0x34b   :  { %v2320_v7 = vpop.f32.mrb[53].mxu1 }
 0x34c   :  { %v2321_v13 = vadd.f32 %v2320_v7, %v2319_v36 }
 0x34e   :  { %v2038_v0 = vadd.f32 %v2321_v13, %v2258_v8 }
 0x36d   :  { %v2354_v44 = vpop.f32.mrb[52].mxu0 }
 0x36e   :  { %v2355_v21 = vpop.f32.mrb[53].mxu0 }
 0x36f   :  { %v2356_v6 = vadd.f32 %v2355_v21, %v2354_v44 }
 0x371   :  { %v2108_v2 = vadd.f32 %v2356_v6, %v2038_v0 }
 0x389   :  { %v2177_v26 = vpop.f32.mrb[54].mxu1 }
 0x38a   :  { %v2178_v51 = vadd.f32 %v2177_v26, %v2108_v2  ;;  %v2460_v4 = vpop.f32.mrb[55].mxu1 }
 0x38c   :  { %2697 = vtanh.f32 %v2178_v51 }
 0x396   :  { %v2698_v10 = vpop.eup %2697 }
 0x397   :  { %2183 = vst.msk [vmem:[#allocation2] sm:$0x3] %vm2182_vm7, %v2698_v10 }
 0x398   :  { %2710 = shalt.err (!%p2707_p4)
}
 0x399   :  { %s2711_s30 = scalar_lea.hbm %s3880_s6, 32 }
 0x39a   :  { %p2712_p5 = scmp.ne.s32.totalorder %s3880_s6, %s2711_s30  ;;  %p2715_p6 = scmp.lt.u32.totalorder %s2711_s30, %s3880_s6 }
 0x39c   :  { %p2717_p7 = pnand %p2715_p6, %p2712_p5 }
 0x39e   :  { %2720 = shalt.err (!%p2717_p7)
}
 0x39f   :  { %2193 = dma.vmem_to_hbm [thread:$0]  %s2191_s2, 32, %s3880_s6, [#allocation3]  }
 0x3a0   :  { %2721 = dma.done.wait [#allocation3], 32  }
 0x3a1   :  { %2722 = vsyncadd [#allocation3], 4294967264 }
 0x3a2   :  { %2197 = vsyncpa [#allocation3], 1 }

</bundles_post_ra>
